<compile_context>
chip_gen: v6e
topology: v6e:2x2x1
jax: 0.10.0
libtpu: 0.0.40
codegen_flags: <defaults>
</compile_context>

<pallas_src>
import functools
import math

import jax
import jax.numpy as jnp
from jax.experimental import pallas as pl
from jax.experimental.pallas import tpu as pltpu

LN_EPS = 1e-5


def _layernorm(z, g, b):
    mean = jnp.mean(z, axis=-1, keepdims=True)
    var = jnp.mean((z - mean) ** 2, axis=-1, keepdims=True)   # biased, like torch LN
    return (z - mean) * jax.lax.rsqrt(var + LN_EPS) * g + b


# --------------------------------------------------------------------------
# Fused encoder-layer kernel
# --------------------------------------------------------------------------
def _encoder_layer_kernel(
        x_ref,                 # (S, D)   f32   full sequence of one batch element
        wqkv_ref,              # (D, 3D)  bf16  fused Q/K/V projection
        bqkv_ref,              # (1, 3D)  f32
        wo_ref,                # (D, D)   bf16
        bo_ref,                # (1, D)   f32
        ln1g_ref, ln1b_ref,    # (1, D)   f32
        w1_ref,                # (D, F)   bf16
        b1_ref,                # (1, F)   f32
        w2_ref,                # (F, D)   bf16
        b2_ref,                # (1, D)   f32
        ln2g_ref, ln2b_ref,    # (1, D)   f32
        o_ref,                 # (TQ, D)  f32   output tile
        q_sc,                  # (H, S, dh) f32  scratch (head-major Q cache)
        k_sc,                  # (H, S, dh) bf16 scratch (head-major K cache)
        v_sc,                  # (H, S, dh) bf16 scratch (head-major V cache)
        *, nhead, dh, seq_tile):
    qi = pl.program_id(1)
    D = nhead * dh
    S = x_ref.shape[0]

    # Once per batch element (first query tile): fused QKV projection over the
    # full sequence, cached head-major in VMEM scratch. The scratch persists
    # across the (sequential, "arbitrary") seq-tile grid axis.
    @pl.when(qi == 0)
    def _():
        xb = x_ref[...].astype(jnp.bfloat16)                       # (S, D)
        qkv = jnp.dot(xb, wqkv_ref[...],
                      preferred_element_type=jnp.float32) + bqkv_ref[...]
        for h in range(nhead):                                     # static, once per seq
            q_sc[h] = qkv[:, h * dh:(h + 1) * dh]
            k_sc[h] = qkv[:, D + h * dh:D + (h + 1) * dh].astype(jnp.bfloat16)
            v_sc[h] = qkv[:, 2 * D + h * dh:2 * D + (h + 1) * dh].astype(jnp.bfloat16)

    row0 = pl.multiple_of(qi * seq_tile, seq_tile)
    x_t = x_ref[pl.ds(row0, seq_tile), :]                          # (TQ, D) residual, f32

    # ---- multi-head attention for this query tile (scores only (H, TQ, S)) ----
    scale = 1.0 / math.sqrt(dh)
    qh = (q_sc[:, pl.ds(row0, seq_tile), :] * scale).astype(jnp.bfloat16)  # (H, TQ, dh)
    kh = k_sc[...]                                                 # (H, S, dh)
    vh = v_sc[...]                                                 # (H, S, dh)

    s = jnp.einsum("hqd,hkd->hqk", qh, kh,
                   preferred_element_type=jnp.float32)             # (H, TQ, S) f32
    s = s - jnp.max(s, axis=-1, keepdims=True)
    p = jnp.exp(s)
    p = p * pl.reciprocal(jnp.sum(p, axis=-1, keepdims=True), approx=True)
    a = jnp.einsum("hqk,hkd->hqd", p.astype(jnp.bfloat16), vh,
                   preferred_element_type=jnp.float32)             # (H, TQ, dh) f32

    attn = jnp.concatenate([a[h] for h in range(nhead)], axis=-1)  # (TQ, D)
    attn = jnp.dot(attn.astype(jnp.bfloat16), wo_ref[...],
                   preferred_element_type=jnp.float32) + bo_ref[...]

    # ---- residual + LayerNorm 1 (post-norm, like nn.TransformerEncoderLayer) ----
    x1 = _layernorm(x_t + attn, ln1g_ref[...], ln1b_ref[...])

    # ---- feed-forward (ReLU) ----
    h1 = jnp.dot(x1.astype(jnp.bfloat16), w1_ref[...],
                 preferred_element_type=jnp.float32) + b1_ref[...]
    h1 = jnp.maximum(h1, 0.0)
    f = jnp.dot(h1.astype(jnp.bfloat16), w2_ref[...],
                preferred_element_type=jnp.float32) + b2_ref[...]

    # ---- residual + LayerNorm 2 ----
    o_ref[...] = _layernorm(x1 + f, ln2g_ref[...], ln2b_ref[...]).astype(o_ref.dtype)


# --------------------------------------------------------------------------
# pallas_call wrapper: one call per encoder layer
# --------------------------------------------------------------------------
def encoder_layer(x, p, *, nhead, seq_tile):
    B, S, D = x.shape
    assert D % nhead == 0
    dh = D // nhead
    F = p["w1"].shape[1]
    assert S % seq_tile == 0, "seq length must be divisible by seq_tile"
    assert seq_tile % 8 == 0 or seq_tile == S, "seq_tile must be a multiple of 8"
    nq = S // seq_tile

    def full2d(shape):
        return pl.BlockSpec(shape, lambda b, qi: (0, 0))

    kernel = functools.partial(_encoder_layer_kernel,
                               nhead=nhead, dh=dh, seq_tile=seq_tile)
    return pl.pallas_call(
        kernel,
        out_shape=jax.ShapeDtypeStruct((B, S, D), x.dtype),
        grid=(B, nq),
        in_specs=[
            pl.BlockSpec((None, S, D), lambda b, qi: (b, 0, 0)),   # x (full sequence)
            full2d((D, 3 * D)),            # wqkv (bf16)
            full2d((1, 3 * D)),            # bqkv
            full2d((D, D)),                # wo   (bf16)
            full2d((1, D)),                # bo
            full2d((1, D)),                # ln1 gamma
            full2d((1, D)),                # ln1 beta
            full2d((D, F)),                # w1   (bf16)
            full2d((1, F)),                # b1
            full2d((F, D)),                # w2   (bf16)
            full2d((1, D)),                # b2
            full2d((1, D)),                # ln2 gamma
            full2d((1, D)),                # ln2 beta
        ],
        out_specs=pl.BlockSpec((None, seq_tile, D), lambda b, qi: (b, qi, 0)),
        scratch_shapes=[
            pltpu.VMEM((nhead, S, dh), jnp.float32),    # Q cache (head-major)
            pltpu.VMEM((nhead, S, dh), jnp.bfloat16),   # K cache (head-major)
            pltpu.VMEM((nhead, S, dh), jnp.bfloat16),   # V cache (head-major)
        ],
        compiler_params=pltpu.CompilerParams(
            # batch axis parallel (megacore), seq-tile axis sequential because
            # the K/V cache is written at the first tile of each batch element.
            dimension_semantics=("parallel", "arbitrary"),
            vmem_limit_bytes=48 * 1024 * 1024,
        ),
    )(x, p["wqkv"], p["bqkv"], p["wo"], p["bo"],
      p["ln1_g"], p["ln1_b"], p["w1"], p["b1"], p["w2"], p["b2"],
      p["ln2_g"], p["ln2_b"])


def transformer_encoder(src, params, *, nhead, seq_tile):
    # The PyTorch module's transpose(0,1) -> encoder -> transpose(0,1) is
    # equivalent to running the encoder batch-first; we do exactly that.
    x = src
    for p in params:
        x = encoder_layer(x, p, nhead=nhead, seq_tile=seq_tile)
    return x


# --------------------------------------------------------------------------
# Parameters (weights stored bf16 for the MXU; everything else f32)
# --------------------------------------------------------------------------
def init_params(key, num_layers, d_model, dim_feedforward):
    params = []
    scale = 0.02
    for _ in range(num_layers):
        key, *ks = jax.random.split(key, 13)

        def nrm(k, shape, s=scale):
            return s * jax.random.normal(k, shape, jnp.float32)

        p = {
            # projection weights stored pre-transposed so kernels compute x @ W
            "wqkv": nrm(ks[0], (d_model, 3 * d_model)).astype(jnp.bfloat16),
            "bqkv": nrm(ks[1], (1, 3 * d_model)),
            "wo":   nrm(ks[2], (d_model, d_model)).astype(jnp.bfloat16),
            "bo":   nrm(ks[3], (1, d_model)),
            "w1":   nrm(ks[4], (d_model, dim_feedforward)).astype(jnp.bfloat16),
            "b1":   nrm(ks[5], (1, dim_feedforward)),
            "w2":   nrm(ks[6], (dim_feedforward, d_model)).astype(jnp.bfloat16),
            "b2":   nrm(ks[7], (1, d_model)),
            "ln1_g": 1.0 + 0.05 * jax.random.normal(ks[8], (1, d_model), jnp.float32),
            "ln1_b": 0.05 * jax.random.normal(ks[9], (1, d_model), jnp.float32),
            "ln2_g": 1.0 + 0.05 * jax.random.normal(ks[10], (1, d_model), jnp.float32),
            "ln2_b": 0.05 * jax.random.normal(ks[11], (1, d_model), jnp.float32),
        }
        params.append(p)
    return params


# --------------------------------------------------------------------------
# Pure-JAX f32 reference (same weights; used for the numeric sanity check)
# --------------------------------------------------------------------------
def _ref_encoder(src, params, *, nhead):
    def ln(z, g, b):
        m = jnp.mean(z, axis=-1, keepdims=True)
        v = jnp.mean((z - m) ** 2, axis=-1, keepdims=True)
        return (z - m) * jax.lax.rsqrt(v + LN_EPS) * g + b

    x = src
    for p in params:
        B, S, D = x.shape
        dh = D // nhead
        qkv = x @ p["wqkv"].astype(jnp.float32) + p["bqkv"]
        q, k, v = qkv[..., :D], qkv[..., D:2 * D], qkv[..., 2 * D:]
        qh = q.reshape(B, S, nhead, dh)
        kh = k.reshape(B, S, nhead, dh)
        vh = v.reshape(B, S, nhead, dh)
        s = jnp.einsum("bqhd,bkhd->bhqk", qh, kh) / math.sqrt(dh)
        a = jnp.einsum("bhqk,bkhd->bqhd", jax.nn.softmax(s, axis=-1), vh)
        a = a.reshape(B, S, D) @ p["wo"].astype(jnp.float32) + p["bo"]
        x = ln(x + a, p["ln1_g"], p["ln1_b"])
        h = jnp.maximum(x @ p["w1"].astype(jnp.float32) + p["b1"], 0.0)
        f = h @ p["w2"].astype(jnp.float32) + p["b2"]
        x = ln(x + f, p["ln2_g"], p["ln2_b"])
    return x


if __name__ == "__main__":
    B, S, D = 2, 16, 32          # batch, seq, d_model
    NHEAD = 4
    FFN_DIM = 64
    NUM_LAYERS = 2
    SEQ_TILE = 8                 # 2 query tiles per sequence -> exercises tiling

    key = jax.random.PRNGKey(0)
    k_x, k_p = jax.random.split(key)
    src = jax.random.normal(k_x, (B, S, D), jnp.float32)
    params = init_params(k_p, NUM_LAYERS, D, FFN_DIM)

    run = jax.jit(functools.partial(transformer_encoder,
                                    nhead=NHEAD, seq_tile=SEQ_TILE))
    out = jax.block_until_ready(run(src, params))

    ref = _ref_encoder(src, params, nhead=NHEAD)
    assert out.shape == (B, S, D)
    err = float(jnp.max(jnp.abs(out - ref)))
    # bf16 MXU operands + approx reciprocal vs. f32 reference -> loose tolerance
    assert err < 3e-2, f"max abs err {err}"

    print("KERNEL_OK")
</pallas_src>

<mosaic_0001>
module attributes {stable_mosaic.version = 11 : i64} {
  func.func @_encoder_layer_kernel(%arg0: i32, %arg1: i32, %arg2: memref<1x16x32xf32, #tpu.memory_space<vmem>>, %arg3: memref<32x96xbf16, #tpu.memory_space<vmem>>, %arg4: memref<1x96xf32, #tpu.memory_space<vmem>>, %arg5: memref<32x32xbf16, #tpu.memory_space<vmem>>, %arg6: memref<1x32xf32, #tpu.memory_space<vmem>>, %arg7: memref<1x32xf32, #tpu.memory_space<vmem>>, %arg8: memref<1x32xf32, #tpu.memory_space<vmem>>, %arg9: memref<32x64xbf16, #tpu.memory_space<vmem>>, %arg10: memref<1x64xf32, #tpu.memory_space<vmem>>, %arg11: memref<64x32xbf16, #tpu.memory_space<vmem>>, %arg12: memref<1x32xf32, #tpu.memory_space<vmem>>, %arg13: memref<1x32xf32, #tpu.memory_space<vmem>>, %arg14: memref<1x32xf32, #tpu.memory_space<vmem>>, %arg15: memref<1x8x32xf32, #tpu.memory_space<vmem>>, %arg16: memref<4x16x8xf32, #tpu.memory_space<vmem>>, %arg17: memref<4x16x8xbf16, #tpu.memory_space<vmem>>, %arg18: memref<4x16x8xbf16, #tpu.memory_space<vmem>>) attributes {dimension_semantics = [#tpu.dimension_semantics<parallel>, #tpu.dimension_semantics<arbitrary>], iteration_bounds = array<i64: 2, 2>, scalar_prefetch = 0 : i64, scratch_operands = 3 : i64, tpu.core_type = #tpu.core_type<tc>, window_params = [{transform_indices = @transform_0, window_bounds = array<i64: 1, 16, 32>}, {pipeline_mode = #tpu.pipeline_mode<synchronous>, transform_indices = @transform_1, window_bounds = array<i64: 32, 96>}, {pipeline_mode = #tpu.pipeline_mode<synchronous>, transform_indices = @transform_2, window_bounds = array<i64: 1, 96>}, {pipeline_mode = #tpu.pipeline_mode<synchronous>, transform_indices = @transform_3, window_bounds = array<i64: 32, 32>}, {pipeline_mode = #tpu.pipeline_mode<synchronous>, transform_indices = @transform_4, window_bounds = array<i64: 1, 32>}, {pipeline_mode = #tpu.pipeline_mode<synchronous>, transform_indices = @transform_5, window_bounds = array<i64: 1, 32>}, {pipeline_mode = #tpu.pipeline_mode<synchronous>, transform_indices = @transform_6, window_bounds = array<i64: 1, 32>}, {pipeline_mode = #tpu.pipeline_mode<synchronous>, transform_indices = @transform_7, window_bounds = array<i64: 32, 64>}, {pipeline_mode = #tpu.pipeline_mode<synchronous>, transform_indices = @transform_8, window_bounds = array<i64: 1, 64>}, {pipeline_mode = #tpu.pipeline_mode<synchronous>, transform_indices = @transform_9, window_bounds = array<i64: 64, 32>}, {pipeline_mode = #tpu.pipeline_mode<synchronous>, transform_indices = @transform_10, window_bounds = array<i64: 1, 32>}, {pipeline_mode = #tpu.pipeline_mode<synchronous>, transform_indices = @transform_11, window_bounds = array<i64: 1, 32>}, {pipeline_mode = #tpu.pipeline_mode<synchronous>, transform_indices = @transform_12, window_bounds = array<i64: 1, 32>}, {transform_indices = @transform_13, window_bounds = array<i64: 1, 8, 32>}]} {
    %c0_i32 = arith.constant 0 : i32
    %0 = arith.cmpi eq, %arg1, %c0_i32 : i32
    %1 = arith.extui %0 : i1 to i32
    %c0_i32_0 = arith.constant 0 : i32
    %2 = arith.cmpi ne, %1, %c0_i32_0 : i32
    scf.if %2 {
      %c0_51 = arith.constant 0 : index
      %c0_52 = arith.constant 0 : index
      %c0_53 = arith.constant 0 : index
      %110 = vector.load %arg2[%c0_51, %c0_52, %c0_53] : memref<1x16x32xf32, #tpu.memory_space<vmem>>, vector<1x16x32xf32>
      %111 = vector.shape_cast %110 : vector<1x16x32xf32> to vector<16x32xf32>
      %112 = arith.truncf %111 : vector<16x32xf32> to vector<16x32xbf16>
      %c0_54 = arith.constant 0 : index
      %c0_55 = arith.constant 0 : index
      %113 = vector.load %arg3[%c0_54, %c0_55] : memref<32x96xbf16, #tpu.memory_space<vmem>>, vector<32x96xbf16>
      %cst_56 = arith.constant dense<0.000000e+00> : vector<16x96xf32>
      %114 = tpu.matmul %112, %113, %cst_56 {dimension_numbers = #tpu.dot_dimension_numbers<[1], [0], [0], [1], [0, 0, 1, 1], [], []>} : vector<16x32xbf16>, vector<32x96xbf16>, vector<16x96xf32> -> vector<16x96xf32>
      %c0_57 = arith.constant 0 : index
      %c0_58 = arith.constant 0 : index
      %115 = vector.load %arg4[%c0_57, %c0_58] : memref<1x96xf32, #tpu.memory_space<vmem>>, vector<1x96xf32>
      %116 = vector.broadcast %115 : vector<1x96xf32> to vector<16x96xf32>
      %117 = arith.addf %114, %116 : vector<16x96xf32>
      %118 = vector.extract_strided_slice %117 {offsets = [0, 0], sizes = [16, 8], strides = [1, 1]} : vector<16x96xf32> to vector<16x8xf32>
      %c0_59 = arith.constant 0 : index
      %c0_60 = arith.constant 0 : index
      %c0_61 = arith.constant 0 : index
      %119 = vector.load %arg16[%c0_59, %c0_60, %c0_61] : memref<4x16x8xf32, #tpu.memory_space<vmem>>, vector<1x16x8xf32>
      %120 = vector.shape_cast %119 : vector<1x16x8xf32> to vector<16x8xf32>
      %121 = vector.shape_cast %118 : vector<16x8xf32> to vector<1x16x8xf32>
      tpu.vector_store %arg16[%c0_59, %c0_60, %c0_61], %121 {strides = array<i32>} : memref<4x16x8xf32, #tpu.memory_space<vmem>>, vector<1x16x8xf32>,
      %122 = vector.extract_strided_slice %117 {offsets = [0, 32], sizes = [16, 8], strides = [1, 1]} : vector<16x96xf32> to vector<16x8xf32>
      %123 = arith.truncf %122 : vector<16x8xf32> to vector<16x8xbf16>
      %c0_62 = arith.constant 0 : index
      %c0_63 = arith.constant 0 : index
      %c0_64 = arith.constant 0 : index
      %124 = vector.load %arg17[%c0_62, %c0_63, %c0_64] : memref<4x16x8xbf16, #tpu.memory_space<vmem>>, vector<1x16x8xbf16>
      %125 = vector.shape_cast %124 : vector<1x16x8xbf16> to vector<16x8xbf16>
      %126 = vector.shape_cast %123 : vector<16x8xbf16> to vector<1x16x8xbf16>
      tpu.vector_store %arg17[%c0_62, %c0_63, %c0_64], %126 {strides = array<i32>} : memref<4x16x8xbf16, #tpu.memory_space<vmem>>, vector<1x16x8xbf16>,
      %127 = vector.extract_strided_slice %117 {offsets = [0, 64], sizes = [16, 8], strides = [1, 1]} : vector<16x96xf32> to vector<16x8xf32>
      %128 = arith.truncf %127 : vector<16x8xf32> to vector<16x8xbf16>
      %c0_65 = arith.constant 0 : index
      %c0_66 = arith.constant 0 : index
      %c0_67 = arith.constant 0 : index
      %129 = vector.load %arg18[%c0_65, %c0_66, %c0_67] : memref<4x16x8xbf16, #tpu.memory_space<vmem>>, vector<1x16x8xbf16>
      %130 = vector.shape_cast %129 : vector<1x16x8xbf16> to vector<16x8xbf16>
      %131 = vector.shape_cast %128 : vector<16x8xbf16> to vector<1x16x8xbf16>
      tpu.vector_store %arg18[%c0_65, %c0_66, %c0_67], %131 {strides = array<i32>} : memref<4x16x8xbf16, #tpu.memory_space<vmem>>, vector<1x16x8xbf16>,
      %132 = vector.extract_strided_slice %117 {offsets = [0, 8], sizes = [16, 8], strides = [1, 1]} : vector<16x96xf32> to vector<16x8xf32>
      %c1 = arith.constant 1 : index
      %c0_68 = arith.constant 0 : index
      %c0_69 = arith.constant 0 : index
      %133 = vector.load %arg16[%c1, %c0_68, %c0_69] : memref<4x16x8xf32, #tpu.memory_space<vmem>>, vector<1x16x8xf32>
      %134 = vector.shape_cast %133 : vector<1x16x8xf32> to vector<16x8xf32>
      %135 = vector.shape_cast %132 : vector<16x8xf32> to vector<1x16x8xf32>
      tpu.vector_store %arg16[%c1, %c0_68, %c0_69], %135 {strides = array<i32>} : memref<4x16x8xf32, #tpu.memory_space<vmem>>, vector<1x16x8xf32>,
      %136 = vector.extract_strided_slice %117 {offsets = [0, 40], sizes = [16, 8], strides = [1, 1]} : vector<16x96xf32> to vector<16x8xf32>
      %137 = arith.truncf %136 : vector<16x8xf32> to vector<16x8xbf16>
      %c1_70 = arith.constant 1 : index
      %c0_71 = arith.constant 0 : index
      %c0_72 = arith.constant 0 : index
      %138 = vector.load %arg17[%c1_70, %c0_71, %c0_72] : memref<4x16x8xbf16, #tpu.memory_space<vmem>>, vector<1x16x8xbf16>
      %139 = vector.shape_cast %138 : vector<1x16x8xbf16> to vector<16x8xbf16>
      %140 = vector.shape_cast %137 : vector<16x8xbf16> to vector<1x16x8xbf16>
      tpu.vector_store %arg17[%c1_70, %c0_71, %c0_72], %140 {strides = array<i32>} : memref<4x16x8xbf16, #tpu.memory_space<vmem>>, vector<1x16x8xbf16>,
      %141 = vector.extract_strided_slice %117 {offsets = [0, 72], sizes = [16, 8], strides = [1, 1]} : vector<16x96xf32> to vector<16x8xf32>
      %142 = arith.truncf %141 : vector<16x8xf32> to vector<16x8xbf16>
      %c1_73 = arith.constant 1 : index
      %c0_74 = arith.constant 0 : index
      %c0_75 = arith.constant 0 : index
      %143 = vector.load %arg18[%c1_73, %c0_74, %c0_75] : memref<4x16x8xbf16, #tpu.memory_space<vmem>>, vector<1x16x8xbf16>
      %144 = vector.shape_cast %143 : vector<1x16x8xbf16> to vector<16x8xbf16>
      %145 = vector.shape_cast %142 : vector<16x8xbf16> to vector<1x16x8xbf16>
      tpu.vector_store %arg18[%c1_73, %c0_74, %c0_75], %145 {strides = array<i32>} : memref<4x16x8xbf16, #tpu.memory_space<vmem>>, vector<1x16x8xbf16>,
      %146 = vector.extract_strided_slice %117 {offsets = [0, 16], sizes = [16, 8], strides = [1, 1]} : vector<16x96xf32> to vector<16x8xf32>
      %c2 = arith.constant 2 : index
      %c0_76 = arith.constant 0 : index
      %c0_77 = arith.constant 0 : index
      %147 = vector.load %arg16[%c2, %c0_76, %c0_77] : memref<4x16x8xf32, #tpu.memory_space<vmem>>, vector<1x16x8xf32>
      %148 = vector.shape_cast %147 : vector<1x16x8xf32> to vector<16x8xf32>
      %149 = vector.shape_cast %146 : vector<16x8xf32> to vector<1x16x8xf32>
      tpu.vector_store %arg16[%c2, %c0_76, %c0_77], %149 {strides = array<i32>} : memref<4x16x8xf32, #tpu.memory_space<vmem>>, vector<1x16x8xf32>,
      %150 = vector.extract_strided_slice %117 {offsets = [0, 48], sizes = [16, 8], strides = [1, 1]} : vector<16x96xf32> to vector<16x8xf32>
      %151 = arith.truncf %150 : vector<16x8xf32> to vector<16x8xbf16>
      %c2_78 = arith.constant 2 : index
      %c0_79 = arith.constant 0 : index
      %c0_80 = arith.constant 0 : index
      %152 = vector.load %arg17[%c2_78, %c0_79, %c0_80] : memref<4x16x8xbf16, #tpu.memory_space<vmem>>, vector<1x16x8xbf16>
      %153 = vector.shape_cast %152 : vector<1x16x8xbf16> to vector<16x8xbf16>
      %154 = vector.shape_cast %151 : vector<16x8xbf16> to vector<1x16x8xbf16>
      tpu.vector_store %arg17[%c2_78, %c0_79, %c0_80], %154 {strides = array<i32>} : memref<4x16x8xbf16, #tpu.memory_space<vmem>>, vector<1x16x8xbf16>,
      %155 = vector.extract_strided_slice %117 {offsets = [0, 80], sizes = [16, 8], strides = [1, 1]} : vector<16x96xf32> to vector<16x8xf32>
      %156 = arith.truncf %155 : vector<16x8xf32> to vector<16x8xbf16>
      %c2_81 = arith.constant 2 : index
      %c0_82 = arith.constant 0 : index
      %c0_83 = arith.constant 0 : index
      %157 = vector.load %arg18[%c2_81, %c0_82, %c0_83] : memref<4x16x8xbf16, #tpu.memory_space<vmem>>, vector<1x16x8xbf16>
      %158 = vector.shape_cast %157 : vector<1x16x8xbf16> to vector<16x8xbf16>
      %159 = vector.shape_cast %156 : vector<16x8xbf16> to vector<1x16x8xbf16>
      tpu.vector_store %arg18[%c2_81, %c0_82, %c0_83], %159 {strides = array<i32>} : memref<4x16x8xbf16, #tpu.memory_space<vmem>>, vector<1x16x8xbf16>,
      %160 = vector.extract_strided_slice %117 {offsets = [0, 24], sizes = [16, 8], strides = [1, 1]} : vector<16x96xf32> to vector<16x8xf32>
      %c3 = arith.constant 3 : index
      %c0_84 = arith.constant 0 : index
      %c0_85 = arith.constant 0 : index
      %161 = vector.load %arg16[%c3, %c0_84, %c0_85] : memref<4x16x8xf32, #tpu.memory_space<vmem>>, vector<1x16x8xf32>
      %162 = vector.shape_cast %161 : vector<1x16x8xf32> to vector<16x8xf32>
      %163 = vector.shape_cast %160 : vector<16x8xf32> to vector<1x16x8xf32>
      tpu.vector_store %arg16[%c3, %c0_84, %c0_85], %163 {strides = array<i32>} : memref<4x16x8xf32, #tpu.memory_space<vmem>>, vector<1x16x8xf32>,
      %164 = vector.extract_strided_slice %117 {offsets = [0, 56], sizes = [16, 8], strides = [1, 1]} : vector<16x96xf32> to vector<16x8xf32>
      %165 = arith.truncf %164 : vector<16x8xf32> to vector<16x8xbf16>
      %c3_86 = arith.constant 3 : index
      %c0_87 = arith.constant 0 : index
      %c0_88 = arith.constant 0 : index
      %166 = vector.load %arg17[%c3_86, %c0_87, %c0_88] : memref<4x16x8xbf16, #tpu.memory_space<vmem>>, vector<1x16x8xbf16>
      %167 = vector.shape_cast %166 : vector<1x16x8xbf16> to vector<16x8xbf16>
      %168 = vector.shape_cast %165 : vector<16x8xbf16> to vector<1x16x8xbf16>
      tpu.vector_store %arg17[%c3_86, %c0_87, %c0_88], %168 {strides = array<i32>} : memref<4x16x8xbf16, #tpu.memory_space<vmem>>, vector<1x16x8xbf16>,
      %169 = vector.extract_strided_slice %117 {offsets = [0, 88], sizes = [16, 8], strides = [1, 1]} : vector<16x96xf32> to vector<16x8xf32>
      %170 = arith.truncf %169 : vector<16x8xf32> to vector<16x8xbf16>
      %c3_89 = arith.constant 3 : index
      %c0_90 = arith.constant 0 : index
      %c0_91 = arith.constant 0 : index
      %171 = vector.load %arg18[%c3_89, %c0_90, %c0_91] : memref<4x16x8xbf16, #tpu.memory_space<vmem>>, vector<1x16x8xbf16>
      %172 = vector.shape_cast %171 : vector<1x16x8xbf16> to vector<16x8xbf16>
      %173 = vector.shape_cast %170 : vector<16x8xbf16> to vector<1x16x8xbf16>
      tpu.vector_store %arg18[%c3_89, %c0_90, %c0_91], %173 {strides = array<i32>} : memref<4x16x8xbf16, #tpu.memory_space<vmem>>, vector<1x16x8xbf16>,
    } else {
    }
    %c8_i32 = arith.constant 8 : i32
    %3 = arith.muli %arg1, %c8_i32 : i32
    %4 = tpu.assume_multiple %3, 8 : i32
    %c0 = arith.constant 0 : index
    %5 = arith.index_cast %4 : i32 to index
    %c0_1 = arith.constant 0 : index
    %6 = vector.load %arg2[%c0, %5, %c0_1] : memref<1x16x32xf32, #tpu.memory_space<vmem>>, vector<1x8x32xf32>
    %7 = vector.shape_cast %6 : vector<1x8x32xf32> to vector<8x32xf32>
    %c0_2 = arith.constant 0 : index
    %8 = arith.index_cast %4 : i32 to index
    %c0_3 = arith.constant 0 : index
    %9 = vector.load %arg16[%c0_2, %8, %c0_3] : memref<4x16x8xf32, #tpu.memory_space<vmem>>, vector<4x8x8xf32>
    %cst = arith.constant 0.353553385 : f32
    %10 = vector.broadcast %cst : f32 to vector<4x8x8xf32>
    %11 = arith.mulf %9, %10 : vector<4x8x8xf32>
    %12 = arith.truncf %11 : vector<4x8x8xf32> to vector<4x8x8xbf16>
    %c0_4 = arith.constant 0 : index
    %c0_5 = arith.constant 0 : index
    %c0_6 = arith.constant 0 : index
    %13 = vector.load %arg17[%c0_4, %c0_5, %c0_6] : memref<4x16x8xbf16, #tpu.memory_space<vmem>>, vector<4x16x8xbf16>
    %c0_7 = arith.constant 0 : index
    %c0_8 = arith.constant 0 : index
    %c0_9 = arith.constant 0 : index
    %14 = vector.load %arg18[%c0_7, %c0_8, %c0_9] : memref<4x16x8xbf16, #tpu.memory_space<vmem>>, vector<4x16x8xbf16>
    "tpu.trace_start"() <{level = 10 : i32, message = "hqd,hkd->hqk"}> : () -> ()
    %cst_10 = arith.constant dense<0.000000e+00> : vector<4x8x16xf32>
    %15 = tpu.matmul %12, %13, %cst_10 {dimension_numbers = #tpu.dot_dimension_numbers<[2], [2], [1], [1], [0, 0, 0, 1, 1, 1], [0], [0]>} : vector<4x8x8xbf16>, vector<4x16x8xbf16>, vector<4x8x16xf32> -> vector<4x8x16xf32>
    "tpu.trace_stop"() : () -> ()
    %cst_11 = arith.constant dense<0xFF800000> : vector<4x8xf32>
    %16 = vector.multi_reduction <maximumf>, %15, %cst_11 [2] : vector<4x8x16xf32> to vector<4x8xf32>
    %17 = vector.shape_cast %16 : vector<4x8xf32> to vector<4x8x1xf32>
    %18 = vector.broadcast %17 : vector<4x8x1xf32> to vector<4x8x16xf32>
    %19 = arith.subf %15, %18 : vector<4x8x16xf32>
    %20 = math.exp %19 : vector<4x8x16xf32>
    %cst_12 = arith.constant dense<0.000000e+00> : vector<4x8xf32>
    %21 = vector.multi_reduction <add>, %20, %cst_12 [2] : vector<4x8x16xf32> to vector<4x8xf32>
    %22 = vector.shape_cast %21 : vector<4x8xf32> to vector<4x8x1xf32>
    %23 = tpu.reciprocal %22 {approx = true} : vector<4x8x1xf32> -> vector<4x8x1xf32>
    %24 = vector.broadcast %23 : vector<4x8x1xf32> to vector<4x8x16xf32>
    %25 = arith.mulf %20, %24 : vector<4x8x16xf32>
    %26 = arith.truncf %25 : vector<4x8x16xf32> to vector<4x8x16xbf16>
    "tpu.trace_start"() <{level = 10 : i32, message = "hqk,hkd->hqd"}> : () -> ()
    %cst_13 = arith.constant dense<0.000000e+00> : vector<4x8x8xf32>
    %27 = tpu.matmul %26, %14, %cst_13 {dimension_numbers = #tpu.dot_dimension_numbers<[2], [1], [1], [2], [0, 0, 0, 1, 1, 2], [0], [0]>} : vector<4x8x16xbf16>, vector<4x16x8xbf16>, vector<4x8x8xf32> -> vector<4x8x8xf32>
    "tpu.trace_stop"() : () -> ()
    %28 = vector.extract_strided_slice %27 {offsets = [0, 0, 0], sizes = [1, 8, 8], strides = [1, 1, 1]} : vector<4x8x8xf32> to vector<1x8x8xf32>
    %29 = vector.shape_cast %28 : vector<1x8x8xf32> to vector<8x8xf32>
    %30 = vector.extract_strided_slice %27 {offsets = [1, 0, 0], sizes = [1, 8, 8], strides = [1, 1, 1]} : vector<4x8x8xf32> to vector<1x8x8xf32>
    %31 = vector.shape_cast %30 : vector<1x8x8xf32> to vector<8x8xf32>
    %32 = vector.extract_strided_slice %27 {offsets = [2, 0, 0], sizes = [1, 8, 8], strides = [1, 1, 1]} : vector<4x8x8xf32> to vector<1x8x8xf32>
    %33 = vector.shape_cast %32 : vector<1x8x8xf32> to vector<8x8xf32>
    %34 = vector.extract_strided_slice %27 {offsets = [3, 0, 0], sizes = [1, 8, 8], strides = [1, 1, 1]} : vector<4x8x8xf32> to vector<1x8x8xf32>
    %35 = vector.shape_cast %34 : vector<1x8x8xf32> to vector<8x8xf32>
    %36 = tpu.concatenate %29, %31, %33, %35 in 1 : vector<8x8xf32>, vector<8x8xf32>, vector<8x8xf32>, vector<8x8xf32> -> vector<8x32xf32>
    %37 = arith.truncf %36 : vector<8x32xf32> to vector<8x32xbf16>
    %c0_14 = arith.constant 0 : index
    %c0_15 = arith.constant 0 : index
    %38 = vector.load %arg5[%c0_14, %c0_15] : memref<32x32xbf16, #tpu.memory_space<vmem>>, vector<32x32xbf16>
    %cst_16 = arith.constant dense<0.000000e+00> : vector<8x32xf32>
    %39 = tpu.matmul %37, %38, %cst_16 {dimension_numbers = #tpu.dot_dimension_numbers<[1], [0], [0], [1], [0, 0, 1, 1], [], []>} : vector<8x32xbf16>, vector<32x32xbf16>, vector<8x32xf32> -> vector<8x32xf32>
    %c0_17 = arith.constant 0 : index
    %c0_18 = arith.constant 0 : index
    %40 = vector.load %arg6[%c0_17, %c0_18] : memref<1x32xf32, #tpu.memory_space<vmem>>, vector<1x32xf32>
    %41 = vector.broadcast %40 : vector<1x32xf32> to vector<8x32xf32>
    %42 = arith.addf %39, %41 : vector<8x32xf32>
    %43 = arith.addf %7, %42 : vector<8x32xf32>
    %c0_19 = arith.constant 0 : index
    %c0_20 = arith.constant 0 : index
    %44 = vector.load %arg7[%c0_19, %c0_20] : memref<1x32xf32, #tpu.memory_space<vmem>>, vector<1x32xf32>
    %c0_21 = arith.constant 0 : index
    %c0_22 = arith.constant 0 : index
    %45 = vector.load %arg8[%c0_21, %c0_22] : memref<1x32xf32, #tpu.memory_space<vmem>>, vector<1x32xf32>
    %cst_23 = arith.constant dense<0.000000e+00> : vector<8xf32>
    %46 = vector.multi_reduction <add>, %43, %cst_23 [1] : vector<8x32xf32> to vector<8xf32>
    %47 = vector.shape_cast %46 : vector<8xf32> to vector<8x1xf32>
    %cst_24 = arith.constant 3.200000e+01 : f32
    %48 = vector.broadcast %cst_24 : f32 to vector<8x1xf32>
    %49 = arith.divf %47, %48 : vector<8x1xf32>
    %50 = vector.broadcast %49 : vector<8x1xf32> to vector<8x32xf32>
    %51 = arith.subf %43, %50 : vector<8x32xf32>
    %52 = arith.mulf %51, %51 : vector<8x32xf32>
    %cst_25 = arith.constant dense<0.000000e+00> : vector<8xf32>
    %53 = vector.multi_reduction <add>, %52, %cst_25 [1] : vector<8x32xf32> to vector<8xf32>
    %54 = vector.shape_cast %53 : vector<8xf32> to vector<8x1xf32>
    %cst_26 = arith.constant 3.200000e+01 : f32
    %55 = vector.broadcast %cst_26 : f32 to vector<8x1xf32>
    %56 = arith.divf %54, %55 : vector<8x1xf32>
    %57 = vector.broadcast %49 : vector<8x1xf32> to vector<8x32xf32>
    %58 = arith.subf %43, %57 : vector<8x32xf32>
    %cst_27 = arith.constant 9.99999974E-6 : f32
    %59 = vector.broadcast %cst_27 : f32 to vector<8x1xf32>
    %60 = arith.addf %56, %59 : vector<8x1xf32>
    %61 = math.rsqrt %60 : vector<8x1xf32>
    %62 = vector.broadcast %61 : vector<8x1xf32> to vector<8x32xf32>
    %63 = arith.mulf %58, %62 : vector<8x32xf32>
    %64 = vector.broadcast %44 : vector<1x32xf32> to vector<8x32xf32>
    %65 = arith.mulf %63, %64 : vector<8x32xf32>
    %66 = vector.broadcast %45 : vector<1x32xf32> to vector<8x32xf32>
    %67 = arith.addf %65, %66 : vector<8x32xf32>
    %68 = arith.truncf %67 : vector<8x32xf32> to vector<8x32xbf16>
    %c0_28 = arith.constant 0 : index
    %c0_29 = arith.constant 0 : index
    %69 = vector.load %arg9[%c0_28, %c0_29] : memref<32x64xbf16, #tpu.memory_space<vmem>>, vector<32x64xbf16>
    %cst_30 = arith.constant dense<0.000000e+00> : vector<8x64xf32>
    %70 = tpu.matmul %68, %69, %cst_30 {dimension_numbers = #tpu.dot_dimension_numbers<[1], [0], [0], [1], [0, 0, 1, 1], [], []>} : vector<8x32xbf16>, vector<32x64xbf16>, vector<8x64xf32> -> vector<8x64xf32>
    %c0_31 = arith.constant 0 : index
    %c0_32 = arith.constant 0 : index
    %71 = vector.load %arg10[%c0_31, %c0_32] : memref<1x64xf32, #tpu.memory_space<vmem>>, vector<1x64xf32>
    %72 = vector.broadcast %71 : vector<1x64xf32> to vector<8x64xf32>
    %73 = arith.addf %70, %72 : vector<8x64xf32>
    %cst_33 = arith.constant 0.000000e+00 : f32
    %74 = vector.broadcast %cst_33 : f32 to vector<8x64xf32>
    %75 = arith.maximumf %73, %74 : vector<8x64xf32>
    %76 = arith.truncf %75 : vector<8x64xf32> to vector<8x64xbf16>
    %c0_34 = arith.constant 0 : index
    %c0_35 = arith.constant 0 : index
    %77 = vector.load %arg11[%c0_34, %c0_35] : memref<64x32xbf16, #tpu.memory_space<vmem>>, vector<64x32xbf16>
    %cst_36 = arith.constant dense<0.000000e+00> : vector<8x32xf32>
    %78 = tpu.matmul %76, %77, %cst_36 {dimension_numbers = #tpu.dot_dimension_numbers<[1], [0], [0], [1], [0, 0, 1, 1], [], []>} : vector<8x64xbf16>, vector<64x32xbf16>, vector<8x32xf32> -> vector<8x32xf32>
    %c0_37 = arith.constant 0 : index
    %c0_38 = arith.constant 0 : index
    %79 = vector.load %arg12[%c0_37, %c0_38] : memref<1x32xf32, #tpu.memory_space<vmem>>, vector<1x32xf32>
    %80 = vector.broadcast %79 : vector<1x32xf32> to vector<8x32xf32>
    %81 = arith.addf %78, %80 : vector<8x32xf32>
    %82 = arith.addf %67, %81 : vector<8x32xf32>
    %c0_39 = arith.constant 0 : index
    %c0_40 = arith.constant 0 : index
    %83 = vector.load %arg13[%c0_39, %c0_40] : memref<1x32xf32, #tpu.memory_space<vmem>>, vector<1x32xf32>
    %c0_41 = arith.constant 0 : index
    %c0_42 = arith.constant 0 : index
    %84 = vector.load %arg14[%c0_41, %c0_42] : memref<1x32xf32, #tpu.memory_space<vmem>>, vector<1x32xf32>
    %cst_43 = arith.constant dense<0.000000e+00> : vector<8xf32>
    %85 = vector.multi_reduction <add>, %82, %cst_43 [1] : vector<8x32xf32> to vector<8xf32>
    %86 = vector.shape_cast %85 : vector<8xf32> to vector<8x1xf32>
    %cst_44 = arith.constant 3.200000e+01 : f32
    %87 = vector.broadcast %cst_44 : f32 to vector<8x1xf32>
    %88 = arith.divf %86, %87 : vector<8x1xf32>
    %89 = vector.broadcast %88 : vector<8x1xf32> to vector<8x32xf32>
    %90 = arith.subf %82, %89 : vector<8x32xf32>
    %91 = arith.mulf %90, %90 : vector<8x32xf32>
    %cst_45 = arith.constant dense<0.000000e+00> : vector<8xf32>
    %92 = vector.multi_reduction <add>, %91, %cst_45 [1] : vector<8x32xf32> to vector<8xf32>
    %93 = vector.shape_cast %92 : vector<8xf32> to vector<8x1xf32>
    %cst_46 = arith.constant 3.200000e+01 : f32
    %94 = vector.broadcast %cst_46 : f32 to vector<8x1xf32>
    %95 = arith.divf %93, %94 : vector<8x1xf32>
    %96 = vector.broadcast %88 : vector<8x1xf32> to vector<8x32xf32>
    %97 = arith.subf %82, %96 : vector<8x32xf32>
    %cst_47 = arith.constant 9.99999974E-6 : f32
    %98 = vector.broadcast %cst_47 : f32 to vector<8x1xf32>
    %99 = arith.addf %95, %98 : vector<8x1xf32>
    %100 = math.rsqrt %99 : vector<8x1xf32>
    %101 = vector.broadcast %100 : vector<8x1xf32> to vector<8x32xf32>
    %102 = arith.mulf %97, %101 : vector<8x32xf32>
    %103 = vector.broadcast %83 : vector<1x32xf32> to vector<8x32xf32>
    %104 = arith.mulf %102, %103 : vector<8x32xf32>
    %105 = vector.broadcast %84 : vector<1x32xf32> to vector<8x32xf32>
    %106 = arith.addf %104, %105 : vector<8x32xf32>
    %c0_48 = arith.constant 0 : index
    %c0_49 = arith.constant 0 : index
    %c0_50 = arith.constant 0 : index
    %107 = vector.load %arg15[%c0_48, %c0_49, %c0_50] : memref<1x8x32xf32, #tpu.memory_space<vmem>>, vector<1x8x32xf32>
    %108 = vector.shape_cast %107 : vector<1x8x32xf32> to vector<8x32xf32>
    %109 = vector.shape_cast %106 : vector<8x32xf32> to vector<1x8x32xf32>
    tpu.vector_store %arg15[%c0_48, %c0_49, %c0_50], %109 {strides = array<i32>} : memref<1x8x32xf32, #tpu.memory_space<vmem>>, vector<1x8x32xf32>,
    return
  }
  func.func @transform_0(%arg0: i32, %arg1: i32) -> (i32, i32, i32) {
    %c0_i32 = arith.constant 0 : i32
    %c0_i32_0 = arith.constant 0 : i32
    %c0_i32_1 = arith.constant 0 : i32
    return %arg0, %c0_i32, %c0_i32_0 : i32, i32, i32
  }
  func.func @transform_1(%arg0: i32, %arg1: i32) -> (i32, i32) {
    %c0_i32 = arith.constant 0 : i32
    %c0_i32_0 = arith.constant 0 : i32
    %c0_i32_1 = arith.constant 0 : i32
    return %c0_i32, %c0_i32_0 : i32, i32
  }
  func.func @transform_2(%arg0: i32, %arg1: i32) -> (i32, i32) {
    %c0_i32 = arith.constant 0 : i32
    %c0_i32_0 = arith.constant 0 : i32
    %c0_i32_1 = arith.constant 0 : i32
    return %c0_i32, %c0_i32_0 : i32, i32
  }
  func.func @transform_3(%arg0: i32, %arg1: i32) -> (i32, i32) {
    %c0_i32 = arith.constant 0 : i32
    %c0_i32_0 = arith.constant 0 : i32
    %c0_i32_1 = arith.constant 0 : i32
    return %c0_i32, %c0_i32_0 : i32, i32
  }
  func.func @transform_4(%arg0: i32, %arg1: i32) -> (i32, i32) {
    %c0_i32 = arith.constant 0 : i32
    %c0_i32_0 = arith.constant 0 : i32
    %c0_i32_1 = arith.constant 0 : i32
    return %c0_i32, %c0_i32_0 : i32, i32
  }
  func.func @transform_5(%arg0: i32, %arg1: i32) -> (i32, i32) {
    %c0_i32 = arith.constant 0 : i32
    %c0_i32_0 = arith.constant 0 : i32
    %c0_i32_1 = arith.constant 0 : i32
    return %c0_i32, %c0_i32_0 : i32, i32
  }
  func.func @transform_6(%arg0: i32, %arg1: i32) -> (i32, i32) {
    %c0_i32 = arith.constant 0 : i32
    %c0_i32_0 = arith.constant 0 : i32
    %c0_i32_1 = arith.constant 0 : i32
    return %c0_i32, %c0_i32_0 : i32, i32
  }
  func.func @transform_7(%arg0: i32, %arg1: i32) -> (i32, i32) {
    %c0_i32 = arith.constant 0 : i32
    %c0_i32_0 = arith.constant 0 : i32
    %c0_i32_1 = arith.constant 0 : i32
    return %c0_i32, %c0_i32_0 : i32, i32
  }
  func.func @transform_8(%arg0: i32, %arg1: i32) -> (i32, i32) {
    %c0_i32 = arith.constant 0 : i32
    %c0_i32_0 = arith.constant 0 : i32
    %c0_i32_1 = arith.constant 0 : i32
    return %c0_i32, %c0_i32_0 : i32, i32
  }
  func.func @transform_9(%arg0: i32, %arg1: i32) -> (i32, i32) {
    %c0_i32 = arith.constant 0 : i32
    %c0_i32_0 = arith.constant 0 : i32
    %c0_i32_1 = arith.constant 0 : i32
    return %c0_i32, %c0_i32_0 : i32, i32
  }
  func.func @transform_10(%arg0: i32, %arg1: i32) -> (i32, i32) {
    %c0_i32 = arith.constant 0 : i32
    %c0_i32_0 = arith.constant 0 : i32
    %c0_i32_1 = arith.constant 0 : i32
    return %c0_i32, %c0_i32_0 : i32, i32
  }
  func.func @transform_11(%arg0: i32, %arg1: i32) -> (i32, i32) {
    %c0_i32 = arith.constant 0 : i32
    %c0_i32_0 = arith.constant 0 : i32
    %c0_i32_1 = arith.constant 0 : i32
    return %c0_i32, %c0_i32_0 : i32, i32
  }
  func.func @transform_12(%arg0: i32, %arg1: i32) -> (i32, i32) {
    %c0_i32 = arith.constant 0 : i32
    %c0_i32_0 = arith.constant 0 : i32
    %c0_i32_1 = arith.constant 0 : i32
    return %c0_i32, %c0_i32_0 : i32, i32
  }
  func.func @transform_13(%arg0: i32, %arg1: i32) -> (i32, i32, i32) {
    %c0_i32 = arith.constant 0 : i32
    %c0_i32_0 = arith.constant 0 : i32
    return %arg0, %arg1, %c0_i32 : i32, i32, i32
  }
}

module attributes {stable_mosaic.version = 11 : i64} {
  func.func @_encoder_layer_kernel(%arg0: i32, %arg1: i32, %arg2: memref<1x16x32xf32, #tpu.memory_space<vmem>>, %arg3: memref<32x96xbf16, #tpu.memory_space<vmem>>, %arg4: memref<1x96xf32, #tpu.memory_space<vmem>>, %arg5: memref<32x32xbf16, #tpu.memory_space<vmem>>, %arg6: memref<1x32xf32, #tpu.memory_space<vmem>>, %arg7: memref<1x32xf32, #tpu.memory_space<vmem>>, %arg8: memref<1x32xf32, #tpu.memory_space<vmem>>, %arg9: memref<32x64xbf16, #tpu.memory_space<vmem>>, %arg10: memref<1x64xf32, #tpu.memory_space<vmem>>, %arg11: memref<64x32xbf16, #tpu.memory_space<vmem>>, %arg12: memref<1x32xf32, #tpu.memory_space<vmem>>, %arg13: memref<1x32xf32, #tpu.memory_space<vmem>>, %arg14: memref<1x32xf32, #tpu.memory_space<vmem>>, %arg15: memref<1x8x32xf32, #tpu.memory_space<vmem>>, %arg16: memref<4x16x8xf32, #tpu.memory_space<vmem>>, %arg17: memref<4x16x8xbf16, #tpu.memory_space<vmem>>, %arg18: memref<4x16x8xbf16, #tpu.memory_space<vmem>>) attributes {dimension_semantics = [#tpu.dimension_semantics<parallel>, #tpu.dimension_semantics<arbitrary>], iteration_bounds = array<i64: 2, 2>, scalar_prefetch = 0 : i64, scratch_operands = 3 : i64, tpu.core_type = #tpu.core_type<tc>, window_params = [{transform_indices = @transform_0, window_bounds = array<i64: 1, 16, 32>}, {pipeline_mode = #tpu.pipeline_mode<synchronous>, transform_indices = @transform_1, window_bounds = array<i64: 32, 96>}, {pipeline_mode = #tpu.pipeline_mode<synchronous>, transform_indices = @transform_2, window_bounds = array<i64: 1, 96>}, {pipeline_mode = #tpu.pipeline_mode<synchronous>, transform_indices = @transform_3, window_bounds = array<i64: 32, 32>}, {pipeline_mode = #tpu.pipeline_mode<synchronous>, transform_indices = @transform_4, window_bounds = array<i64: 1, 32>}, {pipeline_mode = #tpu.pipeline_mode<synchronous>, transform_indices = @transform_5, window_bounds = array<i64: 1, 32>}, {pipeline_mode = #tpu.pipeline_mode<synchronous>, transform_indices = @transform_6, window_bounds = array<i64: 1, 32>}, {pipeline_mode = #tpu.pipeline_mode<synchronous>, transform_indices = @transform_7, window_bounds = array<i64: 32, 64>}, {pipeline_mode = #tpu.pipeline_mode<synchronous>, transform_indices = @transform_8, window_bounds = array<i64: 1, 64>}, {pipeline_mode = #tpu.pipeline_mode<synchronous>, transform_indices = @transform_9, window_bounds = array<i64: 64, 32>}, {pipeline_mode = #tpu.pipeline_mode<synchronous>, transform_indices = @transform_10, window_bounds = array<i64: 1, 32>}, {pipeline_mode = #tpu.pipeline_mode<synchronous>, transform_indices = @transform_11, window_bounds = array<i64: 1, 32>}, {pipeline_mode = #tpu.pipeline_mode<synchronous>, transform_indices = @transform_12, window_bounds = array<i64: 1, 32>}, {transform_indices = @transform_13, window_bounds = array<i64: 1, 8, 32>}]} {
    %c0_i32 = arith.constant 0 : i32
    %0 = arith.cmpi eq, %arg1, %c0_i32 : i32
    %1 = arith.extui %0 : i1 to i32
    %c0_i32_0 = arith.constant 0 : i32
    %2 = arith.cmpi ne, %1, %c0_i32_0 : i32
    scf.if %2 {
      %c0_51 = arith.constant 0 : index
      %c0_52 = arith.constant 0 : index
      %c0_53 = arith.constant 0 : index
      %110 = vector.load %arg2[%c0_51, %c0_52, %c0_53] : memref<1x16x32xf32, #tpu.memory_space<vmem>>, vector<1x16x32xf32>
      %111 = vector.shape_cast %110 : vector<1x16x32xf32> to vector<16x32xf32>
      %112 = arith.truncf %111 : vector<16x32xf32> to vector<16x32xbf16>
      %c0_54 = arith.constant 0 : index
      %c0_55 = arith.constant 0 : index
      %113 = vector.load %arg3[%c0_54, %c0_55] : memref<32x96xbf16, #tpu.memory_space<vmem>>, vector<32x96xbf16>
      %cst_56 = arith.constant dense<0.000000e+00> : vector<16x96xf32>
      %114 = tpu.matmul %112, %113, %cst_56 {dimension_numbers = #tpu.dot_dimension_numbers<[1], [0], [0], [1], [0, 0, 1, 1], [], []>} : vector<16x32xbf16>, vector<32x96xbf16>, vector<16x96xf32> -> vector<16x96xf32>
      %c0_57 = arith.constant 0 : index
      %c0_58 = arith.constant 0 : index
      %115 = vector.load %arg4[%c0_57, %c0_58] : memref<1x96xf32, #tpu.memory_space<vmem>>, vector<1x96xf32>
      %116 = vector.broadcast %115 : vector<1x96xf32> to vector<16x96xf32>
      %117 = arith.addf %114, %116 : vector<16x96xf32>
      %118 = vector.extract_strided_slice %117 {offsets = [0, 0], sizes = [16, 8], strides = [1, 1]} : vector<16x96xf32> to vector<16x8xf32>
      %c0_59 = arith.constant 0 : index
      %c0_60 = arith.constant 0 : index
      %c0_61 = arith.constant 0 : index
      %119 = vector.load %arg16[%c0_59, %c0_60, %c0_61] : memref<4x16x8xf32, #tpu.memory_space<vmem>>, vector<1x16x8xf32>
      %120 = vector.shape_cast %119 : vector<1x16x8xf32> to vector<16x8xf32>
      %121 = vector.shape_cast %118 : vector<16x8xf32> to vector<1x16x8xf32>
      tpu.vector_store %arg16[%c0_59, %c0_60, %c0_61], %121 {strides = array<i32>} : memref<4x16x8xf32, #tpu.memory_space<vmem>>, vector<1x16x8xf32>,
      %122 = vector.extract_strided_slice %117 {offsets = [0, 32], sizes = [16, 8], strides = [1, 1]} : vector<16x96xf32> to vector<16x8xf32>
      %123 = arith.truncf %122 : vector<16x8xf32> to vector<16x8xbf16>
      %c0_62 = arith.constant 0 : index
      %c0_63 = arith.constant 0 : index
      %c0_64 = arith.constant 0 : index
      %124 = vector.load %arg17[%c0_62, %c0_63, %c0_64] : memref<4x16x8xbf16, #tpu.memory_space<vmem>>, vector<1x16x8xbf16>
      %125 = vector.shape_cast %124 : vector<1x16x8xbf16> to vector<16x8xbf16>
      %126 = vector.shape_cast %123 : vector<16x8xbf16> to vector<1x16x8xbf16>
      tpu.vector_store %arg17[%c0_62, %c0_63, %c0_64], %126 {strides = array<i32>} : memref<4x16x8xbf16, #tpu.memory_space<vmem>>, vector<1x16x8xbf16>,
      %127 = vector.extract_strided_slice %117 {offsets = [0, 64], sizes = [16, 8], strides = [1, 1]} : vector<16x96xf32> to vector<16x8xf32>
      %128 = arith.truncf %127 : vector<16x8xf32> to vector<16x8xbf16>
      %c0_65 = arith.constant 0 : index
      %c0_66 = arith.constant 0 : index
      %c0_67 = arith.constant 0 : index
      %129 = vector.load %arg18[%c0_65, %c0_66, %c0_67] : memref<4x16x8xbf16, #tpu.memory_space<vmem>>, vector<1x16x8xbf16>
      %130 = vector.shape_cast %129 : vector<1x16x8xbf16> to vector<16x8xbf16>
      %131 = vector.shape_cast %128 : vector<16x8xbf16> to vector<1x16x8xbf16>
      tpu.vector_store %arg18[%c0_65, %c0_66, %c0_67], %131 {strides = array<i32>} : memref<4x16x8xbf16, #tpu.memory_space<vmem>>, vector<1x16x8xbf16>,
      %132 = vector.extract_strided_slice %117 {offsets = [0, 8], sizes = [16, 8], strides = [1, 1]} : vector<16x96xf32> to vector<16x8xf32>
      %c1 = arith.constant 1 : index
      %c0_68 = arith.constant 0 : index
      %c0_69 = arith.constant 0 : index
      %133 = vector.load %arg16[%c1, %c0_68, %c0_69] : memref<4x16x8xf32, #tpu.memory_space<vmem>>, vector<1x16x8xf32>
      %134 = vector.shape_cast %133 : vector<1x16x8xf32> to vector<16x8xf32>
      %135 = vector.shape_cast %132 : vector<16x8xf32> to vector<1x16x8xf32>
      tpu.vector_store %arg16[%c1, %c0_68, %c0_69], %135 {strides = array<i32>} : memref<4x16x8xf32, #tpu.memory_space<vmem>>, vector<1x16x8xf32>,
      %136 = vector.extract_strided_slice %117 {offsets = [0, 40], sizes = [16, 8], strides = [1, 1]} : vector<16x96xf32> to vector<16x8xf32>
      %137 = arith.truncf %136 : vector<16x8xf32> to vector<16x8xbf16>
      %c1_70 = arith.constant 1 : index
      %c0_71 = arith.constant 0 : index
      %c0_72 = arith.constant 0 : index
      %138 = vector.load %arg17[%c1_70, %c0_71, %c0_72] : memref<4x16x8xbf16, #tpu.memory_space<vmem>>, vector<1x16x8xbf16>
      %139 = vector.shape_cast %138 : vector<1x16x8xbf16> to vector<16x8xbf16>
      %140 = vector.shape_cast %137 : vector<16x8xbf16> to vector<1x16x8xbf16>
      tpu.vector_store %arg17[%c1_70, %c0_71, %c0_72], %140 {strides = array<i32>} : memref<4x16x8xbf16, #tpu.memory_space<vmem>>, vector<1x16x8xbf16>,
      %141 = vector.extract_strided_slice %117 {offsets = [0, 72], sizes = [16, 8], strides = [1, 1]} : vector<16x96xf32> to vector<16x8xf32>
      %142 = arith.truncf %141 : vector<16x8xf32> to vector<16x8xbf16>
      %c1_73 = arith.constant 1 : index
      %c0_74 = arith.constant 0 : index
      %c0_75 = arith.constant 0 : index
      %143 = vector.load %arg18[%c1_73, %c0_74, %c0_75] : memref<4x16x8xbf16, #tpu.memory_space<vmem>>, vector<1x16x8xbf16>
      %144 = vector.shape_cast %143 : vector<1x16x8xbf16> to vector<16x8xbf16>
      %145 = vector.shape_cast %142 : vector<16x8xbf16> to vector<1x16x8xbf16>
      tpu.vector_store %arg18[%c1_73, %c0_74, %c0_75], %145 {strides = array<i32>} : memref<4x16x8xbf16, #tpu.memory_space<vmem>>, vector<1x16x8xbf16>,
      %146 = vector.extract_strided_slice %117 {offsets = [0, 16], sizes = [16, 8], strides = [1, 1]} : vector<16x96xf32> to vector<16x8xf32>
      %c2 = arith.constant 2 : index
      %c0_76 = arith.constant 0 : index
      %c0_77 = arith.constant 0 : index
      %147 = vector.load %arg16[%c2, %c0_76, %c0_77] : memref<4x16x8xf32, #tpu.memory_space<vmem>>, vector<1x16x8xf32>
      %148 = vector.shape_cast %147 : vector<1x16x8xf32> to vector<16x8xf32>
      %149 = vector.shape_cast %146 : vector<16x8xf32> to vector<1x16x8xf32>
      tpu.vector_store %arg16[%c2, %c0_76, %c0_77], %149 {strides = array<i32>} : memref<4x16x8xf32, #tpu.memory_space<vmem>>, vector<1x16x8xf32>,
      %150 = vector.extract_strided_slice %117 {offsets = [0, 48], sizes = [16, 8], strides = [1, 1]} : vector<16x96xf32> to vector<16x8xf32>
      %151 = arith.truncf %150 : vector<16x8xf32> to vector<16x8xbf16>
      %c2_78 = arith.constant 2 : index
      %c0_79 = arith.constant 0 : index
      %c0_80 = arith.constant 0 : index
      %152 = vector.load %arg17[%c2_78, %c0_79, %c0_80] : memref<4x16x8xbf16, #tpu.memory_space<vmem>>, vector<1x16x8xbf16>
      %153 = vector.shape_cast %152 : vector<1x16x8xbf16> to vector<16x8xbf16>
      %154 = vector.shape_cast %151 : vector<16x8xbf16> to vector<1x16x8xbf16>
      tpu.vector_store %arg17[%c2_78, %c0_79, %c0_80], %154 {strides = array<i32>} : memref<4x16x8xbf16, #tpu.memory_space<vmem>>, vector<1x16x8xbf16>,
      %155 = vector.extract_strided_slice %117 {offsets = [0, 80], sizes = [16, 8], strides = [1, 1]} : vector<16x96xf32> to vector<16x8xf32>
      %156 = arith.truncf %155 : vector<16x8xf32> to vector<16x8xbf16>
      %c2_81 = arith.constant 2 : index
      %c0_82 = arith.constant 0 : index
      %c0_83 = arith.constant 0 : index
      %157 = vector.load %arg18[%c2_81, %c0_82, %c0_83] : memref<4x16x8xbf16, #tpu.memory_space<vmem>>, vector<1x16x8xbf16>
      %158 = vector.shape_cast %157 : vector<1x16x8xbf16> to vector<16x8xbf16>
      %159 = vector.shape_cast %156 : vector<16x8xbf16> to vector<1x16x8xbf16>
      tpu.vector_store %arg18[%c2_81, %c0_82, %c0_83], %159 {strides = array<i32>} : memref<4x16x8xbf16, #tpu.memory_space<vmem>>, vector<1x16x8xbf16>,
      %160 = vector.extract_strided_slice %117 {offsets = [0, 24], sizes = [16, 8], strides = [1, 1]} : vector<16x96xf32> to vector<16x8xf32>
      %c3 = arith.constant 3 : index
      %c0_84 = arith.constant 0 : index
      %c0_85 = arith.constant 0 : index
      %161 = vector.load %arg16[%c3, %c0_84, %c0_85] : memref<4x16x8xf32, #tpu.memory_space<vmem>>, vector<1x16x8xf32>
      %162 = vector.shape_cast %161 : vector<1x16x8xf32> to vector<16x8xf32>
      %163 = vector.shape_cast %160 : vector<16x8xf32> to vector<1x16x8xf32>
      tpu.vector_store %arg16[%c3, %c0_84, %c0_85], %163 {strides = array<i32>} : memref<4x16x8xf32, #tpu.memory_space<vmem>>, vector<1x16x8xf32>,
      %164 = vector.extract_strided_slice %117 {offsets = [0, 56], sizes = [16, 8], strides = [1, 1]} : vector<16x96xf32> to vector<16x8xf32>
      %165 = arith.truncf %164 : vector<16x8xf32> to vector<16x8xbf16>
      %c3_86 = arith.constant 3 : index
      %c0_87 = arith.constant 0 : index
      %c0_88 = arith.constant 0 : index
      %166 = vector.load %arg17[%c3_86, %c0_87, %c0_88] : memref<4x16x8xbf16, #tpu.memory_space<vmem>>, vector<1x16x8xbf16>
      %167 = vector.shape_cast %166 : vector<1x16x8xbf16> to vector<16x8xbf16>
      %168 = vector.shape_cast %165 : vector<16x8xbf16> to vector<1x16x8xbf16>
      tpu.vector_store %arg17[%c3_86, %c0_87, %c0_88], %168 {strides = array<i32>} : memref<4x16x8xbf16, #tpu.memory_space<vmem>>, vector<1x16x8xbf16>,
      %169 = vector.extract_strided_slice %117 {offsets = [0, 88], sizes = [16, 8], strides = [1, 1]} : vector<16x96xf32> to vector<16x8xf32>
      %170 = arith.truncf %169 : vector<16x8xf32> to vector<16x8xbf16>
      %c3_89 = arith.constant 3 : index
      %c0_90 = arith.constant 0 : index
      %c0_91 = arith.constant 0 : index
      %171 = vector.load %arg18[%c3_89, %c0_90, %c0_91] : memref<4x16x8xbf16, #tpu.memory_space<vmem>>, vector<1x16x8xbf16>
      %172 = vector.shape_cast %171 : vector<1x16x8xbf16> to vector<16x8xbf16>
      %173 = vector.shape_cast %170 : vector<16x8xbf16> to vector<1x16x8xbf16>
      tpu.vector_store %arg18[%c3_89, %c0_90, %c0_91], %173 {strides = array<i32>} : memref<4x16x8xbf16, #tpu.memory_space<vmem>>, vector<1x16x8xbf16>,
    } else {
    }
    %c8_i32 = arith.constant 8 : i32
    %3 = arith.muli %arg1, %c8_i32 : i32
    %4 = tpu.assume_multiple %3, 8 : i32
    %c0 = arith.constant 0 : index
    %5 = arith.index_cast %4 : i32 to index
    %c0_1 = arith.constant 0 : index
    %6 = vector.load %arg2[%c0, %5, %c0_1] : memref<1x16x32xf32, #tpu.memory_space<vmem>>, vector<1x8x32xf32>
    %7 = vector.shape_cast %6 : vector<1x8x32xf32> to vector<8x32xf32>
    %c0_2 = arith.constant 0 : index
    %8 = arith.index_cast %4 : i32 to index
    %c0_3 = arith.constant 0 : index
    %9 = vector.load %arg16[%c0_2, %8, %c0_3] : memref<4x16x8xf32, #tpu.memory_space<vmem>>, vector<4x8x8xf32>
    %cst = arith.constant 0.353553385 : f32
    %10 = vector.broadcast %cst : f32 to vector<4x8x8xf32>
    %11 = arith.mulf %9, %10 : vector<4x8x8xf32>
    %12 = arith.truncf %11 : vector<4x8x8xf32> to vector<4x8x8xbf16>
    %c0_4 = arith.constant 0 : index
    %c0_5 = arith.constant 0 : index
    %c0_6 = arith.constant 0 : index
    %13 = vector.load %arg17[%c0_4, %c0_5, %c0_6] : memref<4x16x8xbf16, #tpu.memory_space<vmem>>, vector<4x16x8xbf16>
    %c0_7 = arith.constant 0 : index
    %c0_8 = arith.constant 0 : index
    %c0_9 = arith.constant 0 : index
    %14 = vector.load %arg18[%c0_7, %c0_8, %c0_9] : memref<4x16x8xbf16, #tpu.memory_space<vmem>>, vector<4x16x8xbf16>
    "tpu.trace_start"() <{level = 10 : i32, message = "hqd,hkd->hqk"}> : () -> ()
    %cst_10 = arith.constant dense<0.000000e+00> : vector<4x8x16xf32>
    %15 = tpu.matmul %12, %13, %cst_10 {dimension_numbers = #tpu.dot_dimension_numbers<[2], [2], [1], [1], [0, 0, 0, 1, 1, 1], [0], [0]>} : vector<4x8x8xbf16>, vector<4x16x8xbf16>, vector<4x8x16xf32> -> vector<4x8x16xf32>
    "tpu.trace_stop"() : () -> ()
    %cst_11 = arith.constant dense<0xFF800000> : vector<4x8xf32>
    %16 = vector.multi_reduction <maximumf>, %15, %cst_11 [2] : vector<4x8x16xf32> to vector<4x8xf32>
    %17 = vector.shape_cast %16 : vector<4x8xf32> to vector<4x8x1xf32>
    %18 = vector.broadcast %17 : vector<4x8x1xf32> to vector<4x8x16xf32>
    %19 = arith.subf %15, %18 : vector<4x8x16xf32>
    %20 = math.exp %19 : vector<4x8x16xf32>
    %cst_12 = arith.constant dense<0.000000e+00> : vector<4x8xf32>
    %21 = vector.multi_reduction <add>, %20, %cst_12 [2] : vector<4x8x16xf32> to vector<4x8xf32>
    %22 = vector.shape_cast %21 : vector<4x8xf32> to vector<4x8x1xf32>
    %23 = tpu.reciprocal %22 {approx = true} : vector<4x8x1xf32> -> vector<4x8x1xf32>
    %24 = vector.broadcast %23 : vector<4x8x1xf32> to vector<4x8x16xf32>
    %25 = arith.mulf %20, %24 : vector<4x8x16xf32>
    %26 = arith.truncf %25 : vector<4x8x16xf32> to vector<4x8x16xbf16>
    "tpu.trace_start"() <{level = 10 : i32, message = "hqk,hkd->hqd"}> : () -> ()
    %cst_13 = arith.constant dense<0.000000e+00> : vector<4x8x8xf32>
    %27 = tpu.matmul %26, %14, %cst_13 {dimension_numbers = #tpu.dot_dimension_numbers<[2], [1], [1], [2], [0, 0, 0, 1, 1, 2], [0], [0]>} : vector<4x8x16xbf16>, vector<4x16x8xbf16>, vector<4x8x8xf32> -> vector<4x8x8xf32>
    "tpu.trace_stop"() : () -> ()
    %28 = vector.extract_strided_slice %27 {offsets = [0, 0, 0], sizes = [1, 8, 8], strides = [1, 1, 1]} : vector<4x8x8xf32> to vector<1x8x8xf32>
    %29 = vector.shape_cast %28 : vector<1x8x8xf32> to vector<8x8xf32>
    %30 = vector.extract_strided_slice %27 {offsets = [1, 0, 0], sizes = [1, 8, 8], strides = [1, 1, 1]} : vector<4x8x8xf32> to vector<1x8x8xf32>
    %31 = vector.shape_cast %30 : vector<1x8x8xf32> to vector<8x8xf32>
    %32 = vector.extract_strided_slice %27 {offsets = [2, 0, 0], sizes = [1, 8, 8], strides = [1, 1, 1]} : vector<4x8x8xf32> to vector<1x8x8xf32>
    %33 = vector.shape_cast %32 : vector<1x8x8xf32> to vector<8x8xf32>
    %34 = vector.extract_strided_slice %27 {offsets = [3, 0, 0], sizes = [1, 8, 8], strides = [1, 1, 1]} : vector<4x8x8xf32> to vector<1x8x8xf32>
    %35 = vector.shape_cast %34 : vector<1x8x8xf32> to vector<8x8xf32>
    %36 = tpu.concatenate %29, %31, %33, %35 in 1 : vector<8x8xf32>, vector<8x8xf32>, vector<8x8xf32>, vector<8x8xf32> -> vector<8x32xf32>
    %37 = arith.truncf %36 : vector<8x32xf32> to vector<8x32xbf16>
    %c0_14 = arith.constant 0 : index
    %c0_15 = arith.constant 0 : index
    %38 = vector.load %arg5[%c0_14, %c0_15] : memref<32x32xbf16, #tpu.memory_space<vmem>>, vector<32x32xbf16>
    %cst_16 = arith.constant dense<0.000000e+00> : vector<8x32xf32>
    %39 = tpu.matmul %37, %38, %cst_16 {dimension_numbers = #tpu.dot_dimension_numbers<[1], [0], [0], [1], [0, 0, 1, 1], [], []>} : vector<8x32xbf16>, vector<32x32xbf16>, vector<8x32xf32> -> vector<8x32xf32>
    %c0_17 = arith.constant 0 : index
    %c0_18 = arith.constant 0 : index
    %40 = vector.load %arg6[%c0_17, %c0_18] : memref<1x32xf32, #tpu.memory_space<vmem>>, vector<1x32xf32>
    %41 = vector.broadcast %40 : vector<1x32xf32> to vector<8x32xf32>
    %42 = arith.addf %39, %41 : vector<8x32xf32>
    %43 = arith.addf %7, %42 : vector<8x32xf32>
    %c0_19 = arith.constant 0 : index
    %c0_20 = arith.constant 0 : index
    %44 = vector.load %arg7[%c0_19, %c0_20] : memref<1x32xf32, #tpu.memory_space<vmem>>, vector<1x32xf32>
    %c0_21 = arith.constant 0 : index
    %c0_22 = arith.constant 0 : index
    %45 = vector.load %arg8[%c0_21, %c0_22] : memref<1x32xf32, #tpu.memory_space<vmem>>, vector<1x32xf32>
    %cst_23 = arith.constant dense<0.000000e+00> : vector<8xf32>
    %46 = vector.multi_reduction <add>, %43, %cst_23 [1] : vector<8x32xf32> to vector<8xf32>
    %47 = vector.shape_cast %46 : vector<8xf32> to vector<8x1xf32>
    %cst_24 = arith.constant 3.200000e+01 : f32
    %48 = vector.broadcast %cst_24 : f32 to vector<8x1xf32>
    %49 = arith.divf %47, %48 : vector<8x1xf32>
    %50 = vector.broadcast %49 : vector<8x1xf32> to vector<8x32xf32>
    %51 = arith.subf %43, %50 : vector<8x32xf32>
    %52 = arith.mulf %51, %51 : vector<8x32xf32>
    %cst_25 = arith.constant dense<0.000000e+00> : vector<8xf32>
    %53 = vector.multi_reduction <add>, %52, %cst_25 [1] : vector<8x32xf32> to vector<8xf32>
    %54 = vector.shape_cast %53 : vector<8xf32> to vector<8x1xf32>
    %cst_26 = arith.constant 3.200000e+01 : f32
    %55 = vector.broadcast %cst_26 : f32 to vector<8x1xf32>
    %56 = arith.divf %54, %55 : vector<8x1xf32>
    %57 = vector.broadcast %49 : vector<8x1xf32> to vector<8x32xf32>
    %58 = arith.subf %43, %57 : vector<8x32xf32>
    %cst_27 = arith.constant 9.99999974E-6 : f32
    %59 = vector.broadcast %cst_27 : f32 to vector<8x1xf32>
    %60 = arith.addf %56, %59 : vector<8x1xf32>
    %61 = math.rsqrt %60 : vector<8x1xf32>
    %62 = vector.broadcast %61 : vector<8x1xf32> to vector<8x32xf32>
    %63 = arith.mulf %58, %62 : vector<8x32xf32>
    %64 = vector.broadcast %44 : vector<1x32xf32> to vector<8x32xf32>
    %65 = arith.mulf %63, %64 : vector<8x32xf32>
    %66 = vector.broadcast %45 : vector<1x32xf32> to vector<8x32xf32>
    %67 = arith.addf %65, %66 : vector<8x32xf32>
    %68 = arith.truncf %67 : vector<8x32xf32> to vector<8x32xbf16>
    %c0_28 = arith.constant 0 : index
    %c0_29 = arith.constant 0 : index
    %69 = vector.load %arg9[%c0_28, %c0_29] : memref<32x64xbf16, #tpu.memory_space<vmem>>, vector<32x64xbf16>
    %cst_30 = arith.constant dense<0.000000e+00> : vector<8x64xf32>
    %70 = tpu.matmul %68, %69, %cst_30 {dimension_numbers = #tpu.dot_dimension_numbers<[1], [0], [0], [1], [0, 0, 1, 1], [], []>} : vector<8x32xbf16>, vector<32x64xbf16>, vector<8x64xf32> -> vector<8x64xf32>
    %c0_31 = arith.constant 0 : index
    %c0_32 = arith.constant 0 : index
    %71 = vector.load %arg10[%c0_31, %c0_32] : memref<1x64xf32, #tpu.memory_space<vmem>>, vector<1x64xf32>
    %72 = vector.broadcast %71 : vector<1x64xf32> to vector<8x64xf32>
    %73 = arith.addf %70, %72 : vector<8x64xf32>
    %cst_33 = arith.constant 0.000000e+00 : f32
    %74 = vector.broadcast %cst_33 : f32 to vector<8x64xf32>
    %75 = arith.maximumf %73, %74 : vector<8x64xf32>
    %76 = arith.truncf %75 : vector<8x64xf32> to vector<8x64xbf16>
    %c0_34 = arith.constant 0 : index
    %c0_35 = arith.constant 0 : index
    %77 = vector.load %arg11[%c0_34, %c0_35] : memref<64x32xbf16, #tpu.memory_space<vmem>>, vector<64x32xbf16>
    %cst_36 = arith.constant dense<0.000000e+00> : vector<8x32xf32>
    %78 = tpu.matmul %76, %77, %cst_36 {dimension_numbers = #tpu.dot_dimension_numbers<[1], [0], [0], [1], [0, 0, 1, 1], [], []>} : vector<8x64xbf16>, vector<64x32xbf16>, vector<8x32xf32> -> vector<8x32xf32>
    %c0_37 = arith.constant 0 : index
    %c0_38 = arith.constant 0 : index
    %79 = vector.load %arg12[%c0_37, %c0_38] : memref<1x32xf32, #tpu.memory_space<vmem>>, vector<1x32xf32>
    %80 = vector.broadcast %79 : vector<1x32xf32> to vector<8x32xf32>
    %81 = arith.addf %78, %80 : vector<8x32xf32>
    %82 = arith.addf %67, %81 : vector<8x32xf32>
    %c0_39 = arith.constant 0 : index
    %c0_40 = arith.constant 0 : index
    %83 = vector.load %arg13[%c0_39, %c0_40] : memref<1x32xf32, #tpu.memory_space<vmem>>, vector<1x32xf32>
    %c0_41 = arith.constant 0 : index
    %c0_42 = arith.constant 0 : index
    %84 = vector.load %arg14[%c0_41, %c0_42] : memref<1x32xf32, #tpu.memory_space<vmem>>, vector<1x32xf32>
    %cst_43 = arith.constant dense<0.000000e+00> : vector<8xf32>
    %85 = vector.multi_reduction <add>, %82, %cst_43 [1] : vector<8x32xf32> to vector<8xf32>
    %86 = vector.shape_cast %85 : vector<8xf32> to vector<8x1xf32>
    %cst_44 = arith.constant 3.200000e+01 : f32
    %87 = vector.broadcast %cst_44 : f32 to vector<8x1xf32>
    %88 = arith.divf %86, %87 : vector<8x1xf32>
    %89 = vector.broadcast %88 : vector<8x1xf32> to vector<8x32xf32>
    %90 = arith.subf %82, %89 : vector<8x32xf32>
    %91 = arith.mulf %90, %90 : vector<8x32xf32>
    %cst_45 = arith.constant dense<0.000000e+00> : vector<8xf32>
    %92 = vector.multi_reduction <add>, %91, %cst_45 [1] : vector<8x32xf32> to vector<8xf32>
    %93 = vector.shape_cast %92 : vector<8xf32> to vector<8x1xf32>
    %cst_46 = arith.constant 3.200000e+01 : f32
    %94 = vector.broadcast %cst_46 : f32 to vector<8x1xf32>
    %95 = arith.divf %93, %94 : vector<8x1xf32>
    %96 = vector.broadcast %88 : vector<8x1xf32> to vector<8x32xf32>
    %97 = arith.subf %82, %96 : vector<8x32xf32>
    %cst_47 = arith.constant 9.99999974E-6 : f32
    %98 = vector.broadcast %cst_47 : f32 to vector<8x1xf32>
    %99 = arith.addf %95, %98 : vector<8x1xf32>
    %100 = math.rsqrt %99 : vector<8x1xf32>
    %101 = vector.broadcast %100 : vector<8x1xf32> to vector<8x32xf32>
    %102 = arith.mulf %97, %101 : vector<8x32xf32>
    %103 = vector.broadcast %83 : vector<1x32xf32> to vector<8x32xf32>
    %104 = arith.mulf %102, %103 : vector<8x32xf32>
    %105 = vector.broadcast %84 : vector<1x32xf32> to vector<8x32xf32>
    %106 = arith.addf %104, %105 : vector<8x32xf32>
    %c0_48 = arith.constant 0 : index
    %c0_49 = arith.constant 0 : index
    %c0_50 = arith.constant 0 : index
    %107 = vector.load %arg15[%c0_48, %c0_49, %c0_50] : memref<1x8x32xf32, #tpu.memory_space<vmem>>, vector<1x8x32xf32>
    %108 = vector.shape_cast %107 : vector<1x8x32xf32> to vector<8x32xf32>
    %109 = vector.shape_cast %106 : vector<8x32xf32> to vector<1x8x32xf32>
    tpu.vector_store %arg15[%c0_48, %c0_49, %c0_50], %109 {strides = array<i32>} : memref<1x8x32xf32, #tpu.memory_space<vmem>>, vector<1x8x32xf32>,
    return
  }
  func.func @transform_0(%arg0: i32, %arg1: i32) -> (i32, i32, i32) {
    %c0_i32 = arith.constant 0 : i32
    %c0_i32_0 = arith.constant 0 : i32
    %c0_i32_1 = arith.constant 0 : i32
    return %arg0, %c0_i32, %c0_i32_0 : i32, i32, i32
  }
  func.func @transform_1(%arg0: i32, %arg1: i32) -> (i32, i32) {
    %c0_i32 = arith.constant 0 : i32
    %c0_i32_0 = arith.constant 0 : i32
    %c0_i32_1 = arith.constant 0 : i32
    return %c0_i32, %c0_i32_0 : i32, i32
  }
  func.func @transform_2(%arg0: i32, %arg1: i32) -> (i32, i32) {
    %c0_i32 = arith.constant 0 : i32
    %c0_i32_0 = arith.constant 0 : i32
    %c0_i32_1 = arith.constant 0 : i32
    return %c0_i32, %c0_i32_0 : i32, i32
  }
  func.func @transform_3(%arg0: i32, %arg1: i32) -> (i32, i32) {
    %c0_i32 = arith.constant 0 : i32
    %c0_i32_0 = arith.constant 0 : i32
    %c0_i32_1 = arith.constant 0 : i32
    return %c0_i32, %c0_i32_0 : i32, i32
  }
  func.func @transform_4(%arg0: i32, %arg1: i32) -> (i32, i32) {
    %c0_i32 = arith.constant 0 : i32
    %c0_i32_0 = arith.constant 0 : i32
    %c0_i32_1 = arith.constant 0 : i32
    return %c0_i32, %c0_i32_0 : i32, i32
  }
  func.func @transform_5(%arg0: i32, %arg1: i32) -> (i32, i32) {
    %c0_i32 = arith.constant 0 : i32
    %c0_i32_0 = arith.constant 0 : i32
    %c0_i32_1 = arith.constant 0 : i32
    return %c0_i32, %c0_i32_0 : i32, i32
  }
  func.func @transform_6(%arg0: i32, %arg1: i32) -> (i32, i32) {
    %c0_i32 = arith.constant 0 : i32
    %c0_i32_0 = arith.constant 0 : i32
    %c0_i32_1 = arith.constant 0 : i32
    return %c0_i32, %c0_i32_0 : i32, i32
  }
  func.func @transform_7(%arg0: i32, %arg1: i32) -> (i32, i32) {
    %c0_i32 = arith.constant 0 : i32
    %c0_i32_0 = arith.constant 0 : i32
    %c0_i32_1 = arith.constant 0 : i32
    return %c0_i32, %c0_i32_0 : i32, i32
  }
  func.func @transform_8(%arg0: i32, %arg1: i32) -> (i32, i32) {
    %c0_i32 = arith.constant 0 : i32
    %c0_i32_0 = arith.constant 0 : i32
    %c0_i32_1 = arith.constant 0 : i32
    return %c0_i32, %c0_i32_0 : i32, i32
  }
  func.func @transform_9(%arg0: i32, %arg1: i32) -> (i32, i32) {
    %c0_i32 = arith.constant 0 : i32
    %c0_i32_0 = arith.constant 0 : i32
    %c0_i32_1 = arith.constant 0 : i32
    return %c0_i32, %c0_i32_0 : i32, i32
  }
  func.func @transform_10(%arg0: i32, %arg1: i32) -> (i32, i32) {
    %c0_i32 = arith.constant 0 : i32
    %c0_i32_0 = arith.constant 0 : i32
    %c0_i32_1 = arith.constant 0 : i32
    return %c0_i32, %c0_i32_0 : i32, i32
  }
  func.func @transform_11(%arg0: i32, %arg1: i32) -> (i32, i32) {
    %c0_i32 = arith.constant 0 : i32
    %c0_i32_0 = arith.constant 0 : i32
    %c0_i32_1 = arith.constant 0 : i32
    return %c0_i32, %c0_i32_0 : i32, i32
  }
  func.func @transform_12(%arg0: i32, %arg1: i32) -> (i32, i32) {
    %c0_i32 = arith.constant 0 : i32
    %c0_i32_0 = arith.constant 0 : i32
    %c0_i32_1 = arith.constant 0 : i32
    return %c0_i32, %c0_i32_0 : i32, i32
  }
  func.func @transform_13(%arg0: i32, %arg1: i32) -> (i32, i32, i32) {
    %c0_i32 = arith.constant 0 : i32
    %c0_i32_0 = arith.constant 0 : i32
    return %arg0, %arg1, %c0_i32 : i32, i32, i32
  }
}

</mosaic_0001>

<bundles_post_ra>
// kernel: transformer_encoder.2
= control target key start
LH: loop header
LB: loop body
LE: loop exit
PB: predicated region body
PF: predicated region fallthrough
CT: control target
= control target key end

     0   :  { %s2736_s0 = inlined_call_operand.vmem [shape: f32[2,16,32], index: 0, kind: input, shape index: {}]   ;;  %s2737_s1 = inlined_call_operand.vmem [shape: bf16[32,96], index: 1, kind: input, shape index: {}]   ;;  %s2738_s2 = inlined_call_operand.vmem [shape: f32[1,96], index: 2, kind: input, shape index: {}]   ;;  %s2739_s3 = inlined_call_operand.hbm [shape: bf16[32,32], index: 3, kind: input, shape index: {}]   ;;  %s2740_s4 = inlined_call_operand.vmem [shape: f32[1,32], index: 4, kind: input, shape index: {}]   ;;  %s2741_s5 = inlined_call_operand.hbm [shape: f32[1,32], index: 5, kind: input, shape index: {}]   ;;  %s2742_s6 = inlined_call_operand.hbm [shape: f32[1,32], index: 6, kind: input, shape index: {}]   ;;  %s2743_s7 = inlined_call_operand.hbm [shape: bf16[32,64], index: 7, kind: input, shape index: {}]   ;;  %s2744_s8 = inlined_call_operand.hbm [shape: f32[1,64], index: 8, kind: input, shape index: {}]   ;;  %s2745_s9 = inlined_call_operand.vmem [shape: bf16[64,32], index: 9, kind: input, shape index: {}]   ;;  %s2746_s10 = inlined_call_operand.hbm [shape: f32[1,32], index: 10, kind: input, shape index: {}]   ;;  %s2747_s11 = inlined_call_operand.hbm [shape: f32[1,32], index: 11, kind: input, shape index: {}]   ;;  %s2748_s12 = inlined_call_operand.hbm [shape: f32[1,32], index: 12, kind: input, shape index: {}]   ;;  %s2749_s13 = inlined_call_operand.vmem [shape: f32[2,16,32], index: 13, kind: output, shape index: {}]  }
   0x1   :  { %2756 = sst [smem:[#allocation24_spill]] %s2741_s5 }
   0x2   :  { %2757 = sst [smem:[#allocation25_spill]] %s2743_s7 }
   0x3   :  { %2758 = sst [smem:[#allocation26_spill]] %s2746_s10 }
   0x4   :  { %18 = vsyncpa [#allocation6], 0 }
   0x5   :  { %19 = vsyncpa [#allocation8], 0 }
   0x6   :  { %20 = vsyncpa [#allocation11], 0 }
   0x7   :  { %21 = vsyncpa [#allocation14], 0 }
   0x8   :  { %22 = vsyncpa [#allocation17], 0  ;;  %s2426_s25 = smov 0   ;;  %s2428_s26 = smov 0  }
   0x9   :  { %s2430_s27 = smov 0   ;;  %s2432_s28 = smov 0  }
   0xa   :  { %s2434_s29 = smov 0  }
   0xb LB: > { %2759 = sst [smem:[#allocation23_spill]] %s2326_s29  ;;  %s2328_s30 = smov [#allocation7]   ;;  %s2326_s29 = sphi %s2434_s29, %s28_s29   ;;  %s2322_s28 = sphi %s2432_s28, %s2775_s28   ;;  %s2318_s27 = sphi %s2430_s27, %s2774_s27   ;;  %s2314_s26 = sphi %s2428_s26, %s2773_s26   ;;  %s2310_s25 = sphi %s2426_s25, %s2772_s25  }
   0xc   : > { %s386_s14 = sshll.u32 %s2328_s30, 4  ;;  %s1695_s15 = sadd.s32 4294967295, %s2326_s29   ;;  %s387_s14 = int_to_ptr.vmem [resolvable:$true] %s386_s14 }
   0xd   : > { %p1697_p0 = scmp.ge.s32.totalorder %s2326_s29, 1  ;;  %p351_p1 = scmp.lt.s32.totalorder %s2326_s29, 5 }
   0xe   : > { %p2454_p2 = scmp.eq.s32.totalorder %s1695_s15, 0  ;;  %s2329_s18 = smov [#allocation10]  }
   0xf   : > { %p2458_p3 = pnand %p1697_p0, %p351_p1  ;;  %s407_s19 = sshll.u32 %s2329_s18, 4  ;;  %s2464_s19 = int_to_ptr.vmem [resolvable:$true] %s407_s19 }
  0x10   : > { %s2760_s16 = scalar_select %p2454_p2, 1, 0 }
  0x11   : > { %s2761_s17 = scalar_select %p2458_p3, 1, 0 }
  0x12   : > { %p1913_p4 = pneg %p2458_p3  ;;  %s2330_s21 = smov [#allocation13]  }
  0x13   : > { %s435_s22 = sshll.u32 %s2330_s21, 4  ;;  %s2071_s24 = scalar_lea.vmem %s387_s14, 16  ;;  %s2472_s22 = int_to_ptr.vmem [resolvable:$true] %s435_s22 }
  0x14   : > { %p2468_p5 = pnand %p2454_p2, %p1913_p4  ;;  %p2072_p7 = scmp.ne.s32.totalorder %s387_s14, %s2071_s24 }
  0x15   : > { %s2078_s30 = scalar_lea.vmem %s387_s14, 32  ;;  %p2079_p10 = scmp.lt.s32.totalorder %s387_s14, %s387_s14 }
  0x16   : > { %p2476_p6 = pneg %p2468_p5  ;;  %p2080_p11 = scmp.lt.s32.totalorder %s2078_s30, %s2071_s24 }
  0x18   : > { %p2074_p8 = pnand %p2072_p7, %p2476_p6  ;;  %p2081_p12 = por %p2080_p11, %p2079_p10 }
  0x1a   : > { %p2075_p9 = pneg %p2074_p8 }
  0x1c   : > { %p2082_p13 = pnand %p2081_p12, %p2075_p9 }
  0x1e   : > { %2085 = shalt.err (!%p2082_p13)
}
  0x1f   : > { %s2764_s5 = sld [smem:[#allocation24_spill]]  ;;  %s2097_s21 = scalar_lea.vmem %s2464_s19, 256 }
  0x20   : > { %p2098_p0 = scmp.ne.s32.totalorder %s2464_s19, %s2097_s21  ;;  %p2105_p7 = scmp.lt.s32.totalorder %s2464_s19, %s2464_s19 }
  0x21   : > { %p2106_p8 = scmp.lt.s32.totalorder %s2097_s21, %s2097_s21 }
  0x22   : > { %p2100_p1 = pnand %p2098_p0, %p2476_p6 }
  0x23   : > { %p2107_p9 = por %p2106_p8, %p2105_p7 }
  0x24   : > { %p2101_p4 = pneg %p2100_p1 }
  0x25   : > { %1919 = dma.hbm_to_vmem [thread:$0]  (!%p2468_p5), %s2764_s5, 16, %s387_s14, [#allocation8]  }
  0x26   : > { %p2108_p10 = pnand %p2107_p9, %p2101_p4 }
  0x28   : > { %2111 = shalt.err (!%p2108_p10)
}
  0x29   : > { %s2751_s24 = smov 64   ;;  %s2752_s14 = smov 4  }
  0x2a   : > { %s2765_s7 = sld [smem:[#allocation25_spill]]  ;;  %s2123_s18 = scalar_lea.vmem %s2472_s22, 16 }
  0x2b   : > { %p2124_p11 = scmp.ne.s32.totalorder %s2472_s22, %s2123_s18  ;;  %s2130_s21 = scalar_lea.vmem %s2472_s22, 32 }
  0x2c   : > { %p2131_p0 = scmp.lt.s32.totalorder %s2472_s22, %s2472_s22  ;;  %p2132_p1 = scmp.lt.s32.totalorder %s2130_s21, %s2123_s18 }
  0x2d   : > { %p2126_p12 = pnand %p2124_p11, %p2476_p6 }
  0x2e   : > { %p2133_p4 = por %p2132_p1, %p2131_p0 }
  0x2f   : > { %p2127_p13 = pneg %p2126_p12 }
  0x30   : > { %1925 = dma.hbm_to_vmem [thread:$0]  (!%p2468_p5), %s2765_s7, 256, %s2464_s19, [#allocation11], %s2751_s24, %s2751_s24, %s2752_s14  }
  0x31   : > { %p2134_p7 = pnand %p2133_p4, %p2127_p13 }
  0x33   : > { %2137 = shalt.err (!%p2134_p7)
}
  0x34   : > { %s2766_s10 = sld [smem:[#allocation26_spill]]  ;;  %s37_s19 = sadd.s32 1, %s2318_s27 }
  0x35   : > { %s40_s30 = sadd.s32 1, %s2322_s28  ;;  %p38_p8 = scmp.ge.s32.totalorder %s37_s19, 2 }
  0x36   : > { %s2333_s15 = smov [#allocation5]   ;;  %s2334_s18 = smov [#allocation9]  }
  0x37   : > { %s369_s24 = sshll.u32 %s2333_s15, 4  ;;  %s2777_s19 = smov (%p38_p8, %s37_s19), 0  ;;  %s370_s24 = int_to_ptr.vmem [resolvable:$true] %s369_s24 }
  0x38   : > { %s2779_s30 = smov (!%p38_p8, %s40_s30), %s2322_s28  ;;  %s397_s21 = sshll.u32 %s2334_s18, 4  ;;  %s398_s21 = int_to_ptr.vmem [resolvable:$true] %s397_s21 }
  0x39   : > { %p42_p9 = scmp.ge.s32.totalorder %s2779_s30, 2  ;;  %s2149_s14 = scalar_lea.vmem %s370_s24, 256 }
  0x3a   : > { %1931 = dma.hbm_to_vmem [thread:$0]  (!%p2468_p5), %s2766_s10, 16, %s2472_s22, [#allocation14]  }
  0x3b   : > { %p2150_p10 = scmp.ne.s32.totalorder %s370_s24, %s2149_s14  ;;  %p2157_p13 = scmp.lt.s32.totalorder %s370_s24, %s370_s24 }
  0x3c   : > { %p2158_p0 = scmp.lt.s32.totalorder %s2149_s14, %s2149_s14 }
  0x3d   : > { %p2152_p11 = pnand %p2150_p10, %p2476_p6 }
  0x3e   : > { %p2159_p1 = por %p2158_p0, %p2157_p13 }
  0x3f   : > { %p2153_p12 = pneg %p2152_p11 }
  0x41   : > { %p2160_p4 = pnand %p2159_p1, %p2153_p12 }
  0x43   : > { %2163 = shalt.err (!%p2160_p4)
}
  0x44   : > { %s2767_s5 = smov 4   ;;  %s2768_s29 = smov 64  }
  0x45   : > { %1916 = dma.hbm_to_vmem [thread:$0]  (!%p2468_p5), %s2739_s3, 256, %s370_s24, [#allocation6], %s2768_s29, %s2768_s29, %s2767_s5  }
  0x46   : > { %s2781_s30 = smov (%p42_p9, %s2779_s30), 0  ;;  %s2175_s18 = scalar_lea.vmem %s398_s21, 16 }
  0x47   : > { %p2176_p7 = scmp.ne.s32.totalorder %s398_s21, %s2175_s18  ;;  %s2182_s14 = scalar_lea.vmem %s398_s21, 32 }
  0x48   : > { %p2183_p11 = scmp.lt.s32.totalorder %s398_s21, %s398_s21  ;;  %p2184_p12 = scmp.lt.s32.totalorder %s2182_s14, %s2175_s18 }
  0x49   : > { %p2178_p8 = pnand %p2176_p7, %p2476_p6 }
  0x4a   : > { %p2185_p13 = por %p2184_p12, %p2183_p11 }
  0x4b   : > { %p2179_p10 = pneg %p2178_p8 }
  0x4d   : > { %p2186_p0 = pnand %p2185_p13, %p2179_p10 }
  0x4f   : > { %2189 = shalt.err (!%p2186_p0)
}
  0x50   : > { %1922 = dma.hbm_to_vmem [thread:$0]  (!%p2468_p5), %s2742_s6, 16, %s398_s21, [#allocation8]  }
  0x51   : > { %s2335_s24 = smov [#allocation12]   ;;  %s2336_s29 = smov [#allocation15]  }
  0x52   : > { %s421_s5 = sshll.u32 %s2335_s24, 4  ;;  %s446_s22 = sshll.u32 %s2336_s29, 4  ;;  %s422_s5 = int_to_ptr.vmem [resolvable:$true] %s421_s5  ;;  %s447_s22 = int_to_ptr.vmem [resolvable:$true] %s446_s22 }
  0x53   : > { %s2201_s15 = scalar_lea.vmem %s422_s5, 16  ;;  %s2208_s18 = scalar_lea.vmem %s422_s5, 32 }
  0x54   : > { %p2202_p9 = scmp.ne.s32.totalorder %s422_s5, %s2201_s15  ;;  %p2209_p7 = scmp.lt.s32.totalorder %s422_s5, %s422_s5 }
  0x55   : > { %p2210_p8 = scmp.lt.s32.totalorder %s2208_s18, %s2201_s15 }
  0x56   : > { %p2204_p1 = pnand %p2202_p9, %p2476_p6 }
  0x57   : > { %p2211_p10 = por %p2210_p8, %p2209_p7 }
  0x58   : > { %p2205_p4 = pneg %p2204_p1 }
  0x5a   : > { %p2212_p11 = pnand %p2211_p10, %p2205_p4 }
  0x5c   : > { %2215 = shalt.err (!%p2212_p11)
}
  0x5d   : > { %1928 = dma.hbm_to_vmem [thread:$0]  (!%p2468_p5), %s2744_s8, 16, %s422_s5, [#allocation11]  }
  0x5e   : > { %s2227_s21 = scalar_lea.vmem %s447_s22, 16  ;;  %s2234_s14 = scalar_lea.vmem %s447_s22, 32 }
  0x5f   : > { %p2228_p12 = scmp.ne.s32.totalorder %s447_s22, %s2227_s21  ;;  %p2235_p9 = scmp.lt.s32.totalorder %s447_s22, %s447_s22 }
  0x60   : > { %p2236_p1 = scmp.lt.s32.totalorder %s2234_s14, %s2227_s21 }
  0x61   : > { %p2230_p13 = pnand %p2228_p12, %p2476_p6 }
  0x62   : > { %p2237_p2 = por %p2236_p1, %p2235_p9 }
  0x63   : > { %p2231_p0 = pneg %p2230_p13 }
  0x65   : > { %p2238_p3 = pnand %p2237_p2, %p2231_p0 }
  0x67   : > { %2241 = shalt.err (!%p2238_p3)
}
  0x68   : > { %1934 = dma.hbm_to_vmem [thread:$0]  (!%p2468_p5), %s2747_s11, 16, %s447_s22, [#allocation14]  }
  0x69   : > { %s2337_s15 = smov [#allocation16]  }
  0x6a   : > { %s457_s5 = sshll.u32 %s2337_s15, 4  ;;  %s458_s5 = int_to_ptr.vmem [resolvable:$true] %s457_s5 }
  0x6b   : > { %s2253_s18 = scalar_lea.vmem %s458_s5, 16  ;;  %s2260_s7 = scalar_lea.vmem %s458_s5, 32 }
  0x6c   : > { %p2254_p4 = scmp.ne.s32.totalorder %s458_s5, %s2253_s18  ;;  %p2261_p10 = scmp.lt.s32.totalorder %s458_s5, %s458_s5 }
  0x6d   : > { %p2262_p11 = scmp.lt.s32.totalorder %s2260_s7, %s2253_s18 }
  0x6e   : > { %p2256_p7 = pnand %p2254_p4, %p2476_p6 }
  0x6f   : > { %p2263_p2 = por %p2262_p11, %p2261_p10 }
  0x70   : > { %p2257_p8 = pneg %p2256_p7 }
  0x72   : > { %p2264_p3 = pnand %p2263_p2, %p2257_p8 }
  0x74   : > { %2267 = shalt.err (!%p2264_p3)
}
  0x75   : > { %1937 = dma.hbm_to_vmem [thread:$0]  (!%p2468_p5), %s2748_s12, 16, %s458_s5, [#allocation17]  }
  0x76   : > { %p2769_p12 = scmp.ne.s32.totalorder %s2761_s17, 0 }
  0x77   : > { %p2770_p13 = scmp.ne.s32.totalorder (!%p2769_p12), %s2760_s16, 0 }
  0x78   : > { %478 = sbr.rel (%p2769_p12) target bundleno = 2562 (0xa02), region = 72 }
  0x7d   : > { %2289 = dma.done.wait (%p2770_p13), [#allocation6], 256  }
  0x7e   : > { %2291 = vsyncadd (%p2770_p13), [#allocation6], 4294967040 }
  0x7f   : > { %2293 = dma.done.wait (%p2770_p13), [#allocation8], 32  }
  0x80   : > { %2295 = vsyncadd (%p2770_p13), [#allocation8], 4294967264 }
  0x81   : > { %2297 = dma.done.wait (%p2770_p13), [#allocation11], 272  }
  0x82   : > { %2299 = vsyncadd (%p2770_p13), [#allocation11], 4294967024 }
  0x83   : > { %2301 = dma.done.wait (%p2770_p13), [#allocation14], 32  }
  0x84   : > { %2303 = vsyncadd (%p2770_p13), [#allocation14], 4294967264 }
  0x85   : > { %2305 = dma.done.wait (%p2770_p13), [#allocation17], 16  }
  0x86   : > { %2307 = vsyncadd (%p2770_p13), [#allocation17], 4294967280  ;;  %p553_p5 = scmp.lt.s32.totalorder %s2314_s26, 1  ;;  %p560_p6 = scmp.lt.s32.totalorder %s2310_s25, 1 }
  0x87   : > { %p1720_p0 = scmp.ne.s32.totalorder %s2310_s25, 0 }
  0x88   : > { %s2783_s26 = smov (!%p553_p5, %s2314_s26), 1  ;;  %s2341_s22 = smov (!%p1720_p0), 64  }
  0x89   : > { %s561_s17 = scalar_select %p560_p6, %s2310_s25, 1 }
  0x8a   : > { %s1764_s20 = sshll.u32 %s2783_s26, 4  ;;  %s1718_s23 = sshll.u32 %s2783_s26, 1 }
  0x8b   : > { %s2589_s24 = scalar_lea.vmem %s2736_s0, %s1764_s20  ;;  %s563_s29 = sadd.s32 %s1718_s23, %s561_s17 }
  0x8c   : > { %s1719_s15 = sshll.u32 %s563_s29, 3  ;;  %570 = sbr.rel (%p1720_p0) target bundleno = 507 (0x1fb), region = 108 }
  0x8d   : > { %s2594_s18 = scalar_lea.vmem %s2749_s13, %s1719_s15  ;;  %s2340_s23 = smov (!%p1720_p0), 120  }
  0x8e   : > { %s2342_s14 = smov (!%p1720_p0), 112   ;;  %s2343_s29 = smov (!%p1720_p0), 104  }
  0x8f   : > { %s2344_s15 = smov (!%p1720_p0), 96   ;;  %s2345_s5 = smov (!%p1720_p0), 88  }
  0x90   : > { %s2346_s16 = smov (!%p1720_p0), 56   ;;  %s2347_s7 = smov (!%p1720_p0), 80  }
  0x91   : > { %v2022_v0 = vld [vmem:[%s2737_s1 + $0x8] sm:$0xff]   ;;  %v2338_v1 = vmov 0.0   ;;  %v2023_v2 = vld [vmem:[%s2737_s1] sm:$0xff]   ;;  %vm2339_vm0 = vmmov 0   ;;  %vm597_vm1 = vcmask 261120   ;;  %vm642_vm2 = vcmask 64512  }
  0x92   : > { %1797 = vmatprep.subr.bf16.mxu0 %v2338_v1  ;;  %1801 = vmatprep.mubr.msk.bf16.mxu0 %vm2339_vm0, %v2338_v1  ;;  %v571_v3 = vld [vmem:[%s2589_s24] sm:$0xff]  ;;  %v572_v4 = vld [vmem:[%s2589_s24 + $0x8] sm:$0xff]  ;;  %s2348_s10 = smov 48   ;;  %s2349_s26 = smov 72   ;;  %vm657_vm3 = vcmask 60416  }
  0x93   : > { %1798 = vmatpush3.bf16.msra.mxu0 %v2022_v0  ;;  %v573_v5 = vpack.c.bf16 %v572_v4, %v571_v3  ;;  %v1721_v6 = vld [vmem:[%s2738_s2] ss:$0 sm:$0xff]  ;;  %s2350_s21 = smov 40  }
  0x94   : > { %1799 = vmatprep.subr.bf16.mxu0 %v2338_v1 }
  0x97   : > { %1800 = vmatpush3.bf16.msra.mxu0 %v2023_v2 }
  0x9a   : > { %1802 = vmatmul.mubr.msk.bf16.vlgmr.msra.gmra.mxu0 %vm597_vm1, %v573_v5 }
 0x15a   : > { %v635_v7 = vpop.f32.mrf.mxu0 }
 0x15b   : > { %v636_v8 = vadd.f32 %v1721_v6, %v635_v7 }
 0x15c   : > { %v1803_v9 = vpop.f32.mrf.mxu0 }
 0x15d   : > { %643 = vst.msk [vmem:[#allocation2] sm:$0xff] %vm642_vm2, %v636_v8  ;;  %v1765_v10 = vpack.c.bf16 %v636_v8, %v636_v8  ;;  %670 = vrot.lane.b32.xlu0 %v636_v8, %s2340_s23 }
 0x15e   : > { %v638_v11 = vpop.f32.mrf.mxu0 }
 0x15f   : > { %v639_v12 = vadd.f32 %v1721_v6, %v638_v11  ;;  %660 = vrot.lane.b32.xlu1 %v1765_v10, %s2341_s22 }
 0x160   : > { %v1804_v13 = vpop.f32.mrf.mxu0 }
 0x161   : > { %644 = vst.msk [vmem:[#allocation2 + $0x8] sm:$0xff] %vm642_vm2, %v639_v12  ;;  %697 = vrot.lane.b32.xlu0 %v636_v8, %s2342_s14  ;;  %v1766_v14 = vpack.c.bf16 %v639_v12, %v639_v12 }
 0x163   : > { %672 = vrot.lane.b32.xlu1 %v639_v12, %s2340_s23 }
 0x165   : > { %724 = vrot.lane.b32.xlu0 %v636_v8, %s2343_s29 }
 0x167   : > { %699 = vrot.lane.b32.xlu1 %v639_v12, %s2342_s14 }
 0x169   : > { %651 = vrot.lane.b32.xlu0 %v1765_v10, %s2344_s15 }
 0x16b   : > { %726 = vrot.lane.b32.xlu1 %v639_v12, %s2343_s29 }
 0x16d   : > { %679 = vrot.lane.b32.xlu0 %v1765_v10, %s2345_s5 }
 0x16f   : > { %662 = vrot.lane.b32.xlu1 %v1766_v14, %s2341_s22 }
 0x171   : > { %688 = vrot.lane.b32.xlu0 %v1765_v10, %s2346_s16 }
 0x173   : > { %681 = vrot.lane.b32.xlu1 %v1766_v14, %s2345_s5 }
 0x175   : > { %706 = vrot.lane.b32.xlu0 %v1765_v10, %s2347_s7 }
 0x177   : > { %690 = vrot.lane.b32.xlu1 %v1766_v14, %s2346_s16 }
 0x179   : > { %715 = vrot.lane.b32.xlu0 %v1765_v10, %s2348_s10 }
 0x17b   : > { %708 = vrot.lane.b32.xlu1 %v1766_v14, %s2347_s7 }
 0x17d   : > { %733 = vrot.lane.b32.xlu0 %v1765_v10, %s2349_s26 }
 0x17f   : > { %717 = vrot.lane.b32.xlu1 %v1766_v14, %s2348_s10 }
 0x181   : > { %653 = vrot.lane.b32.xlu0 %v1766_v14, %s2344_s15 }
 0x183   : > { %735 = vrot.lane.b32.xlu1 %v1766_v14, %s2349_s26 }
 0x185   : > { %742 = vrot.lane.b32.xlu0 %v1765_v10, %s2350_s21 }
 0x187   : > { %744 = vrot.lane.b32.xlu1 %v1766_v14, %s2350_s21 }
 0x1cf   : > { %v671_v15 = vpop.permute.xlu0 %670 }
 0x1d0   : > { %677 = vst.msk [vmem:[#allocation2 + $0x10] sm:$0xff] %vm642_vm2, %v671_v15 }
 0x1d1   : > { %v661_v16 = vpop.permute.xlu1 %660 }
 0x1d2   : > { %666 = vst.msk [vmem:[#allocation4] sm:$0xf] %vm657_vm3, %v661_v16 }
 0x1d3   : > { %v698_v17 = vpop.permute.xlu0 %697 }
 0x1d4   : > { %704 = vst.msk [vmem:[#allocation2 + $0x20] sm:$0xff] %vm642_vm2, %v698_v17 }
 0x1d5   : > { %v673_v18 = vpop.permute.xlu1 %672 }
 0x1d6   : > { %678 = vst.msk [vmem:[#allocation2 + $0x18] sm:$0xff] %vm642_vm2, %v673_v18 }
 0x1d7   : > { %v725_v19 = vpop.permute.xlu0 %724 }
 0x1d8   : > { %731 = vst.msk [vmem:[#allocation2 + $0x30] sm:$0xff] %vm642_vm2, %v725_v19 }
 0x1d9   : > { %v700_v20 = vpop.permute.xlu1 %699 }
 0x1da   : > { %705 = vst.msk [vmem:[#allocation2 + $0x28] sm:$0xff] %vm642_vm2, %v700_v20 }
 0x1db   : > { %v652_v21 = vpop.permute.xlu0 %651 }
 0x1dc   : > { %658 = vst.msk [vmem:[#allocation3] sm:$0xf] %vm657_vm3, %v652_v21 }
 0x1dd   : > { %v727_v22 = vpop.permute.xlu1 %726 }
 0x1de   : > { %732 = vst.msk [vmem:[#allocation2 + $0x38] sm:$0xff] %vm642_vm2, %v727_v22 }
 0x1df   : > { %v680_v23 = vpop.permute.xlu0 %679 }
 0x1e0   : > { %686 = vst.msk [vmem:[#allocation3 + $0x8] sm:$0xf] %vm657_vm3, %v680_v23 }
 0x1e1   : > { %v663_v24 = vpop.permute.xlu1 %662 }
 0x1e2   : > { %667 = vst.msk [vmem:[#allocation4 + $0x4] sm:$0xf] %vm657_vm3, %v663_v24 }
 0x1e3   : > { %v689_v25 = vpop.permute.xlu0 %688 }
 0x1e4   : > { %695 = vst.msk [vmem:[#allocation4 + $0x8] sm:$0xf] %vm657_vm3, %v689_v25 }
 0x1e5   : > { %v682_v26 = vpop.permute.xlu1 %681 }
 0x1e6   : > { %687 = vst.msk [vmem:[#allocation3 + $0xc] sm:$0xf] %vm657_vm3, %v682_v26 }
 0x1e7   : > { %v707_v27 = vpop.permute.xlu0 %706 }
 0x1e8   : > { %713 = vst.msk [vmem:[#allocation3 + $0x10] sm:$0xf] %vm657_vm3, %v707_v27 }
 0x1e9   : > { %v691_v28 = vpop.permute.xlu1 %690 }
 0x1ea   : > { %696 = vst.msk [vmem:[#allocation4 + $0xc] sm:$0xf] %vm657_vm3, %v691_v28 }
 0x1eb   : > { %v716_v29 = vpop.permute.xlu0 %715 }
 0x1ec   : > { %722 = vst.msk [vmem:[#allocation4 + $0x10] sm:$0xf] %vm657_vm3, %v716_v29 }
 0x1ed   : > { %v709_v30 = vpop.permute.xlu1 %708 }
 0x1ee   : > { %714 = vst.msk [vmem:[#allocation3 + $0x14] sm:$0xf] %vm657_vm3, %v709_v30 }
 0x1ef   : > { %v734_v31 = vpop.permute.xlu0 %733 }
 0x1f0   : > { %740 = vst.msk [vmem:[#allocation3 + $0x18] sm:$0xf] %vm657_vm3, %v734_v31 }
 0x1f1   : > { %v718_v32 = vpop.permute.xlu1 %717 }
 0x1f2   : > { %723 = vst.msk [vmem:[#allocation4 + $0x14] sm:$0xf] %vm657_vm3, %v718_v32 }
 0x1f3   : > { %v654_v33 = vpop.permute.xlu0 %653 }
 0x1f4   : > { %659 = vst.msk [vmem:[#allocation3 + $0x4] sm:$0xf] %vm657_vm3, %v654_v33 }
 0x1f5   : > { %v736_v34 = vpop.permute.xlu1 %735 }
 0x1f6   : > { %741 = vst.msk [vmem:[#allocation3 + $0x1c] sm:$0xf] %vm657_vm3, %v736_v34 }
 0x1f7   : > { %v743_v35 = vpop.permute.xlu0 %742 }
 0x1f8   : > { %749 = vst.msk [vmem:[#allocation4 + $0x18] sm:$0xf] %vm657_vm3, %v743_v35 }
 0x1f9   : > { %v745_v36 = vpop.permute.xlu1 %744 }
 0x1fa   : > { %750 = vst.msk [vmem:[#allocation4 + $0x1c] sm:$0xf] %vm657_vm3, %v745_v36 }
 0x1fb PF: > { %v2024_v37 = vld [vmem:[#allocation3] sm:$0xff]   ;;  %v2351_v38 = vmov 0.0   ;;  %vm788_vm4 = vcmask 64512   ;;  %v2025_v39 = vld [vmem:[#allocation3 + $0x10] sm:$0xff]   ;;  %s1727_s17 = sshll.u32 %s2310_s25, 3  ;;  %v2026_v41 = vld [vmem:[#allocation3 + $0x8] sm:$0xff]  }
 0x1fc   : > { %1805 = vmatprep.subr.bf16.mxu1 %v2351_v38  ;;  %1817 = vmatprep.subr.bf16.mxu0 %v2351_v38  ;;  %v793_v40 = vsel %vm788_vm4, %v2024_v37, 0  ;;  %v895_v42 = vsel %vm788_vm4, %v2025_v39, 0  ;;  %vm2352_vm5 = vmmov 0   ;;  %s754_s20 = scalar_lea.vmem [#allocation2], %s1727_s17  ;;  %v844_v50 = vsel %vm788_vm4, %v2026_v41, 0  ;;  %v2028_v34 = vld [vmem:[#allocation4] sm:$0xff]   ;;  %s752_s29 = scalar_lea.vmem %s2589_s24, %s1727_s17 }
 0x1fd   : > { %1806 = vmatpush3.bf16.xpose.msra.mxu1 %v793_v40  ;;  %1807 = vmatprep.mubr.msk.bf16.mxu1 %vm2352_vm5, %v2351_v38  ;;  %v755_v43 = vld [vmem:[%s754_s20] sm:$0xff]  ;;  %v756_v47 = vld [vmem:[%s754_s20 + $0x10] sm:$0xff]  ;;  %v2027_v52 = vld [vmem:[#allocation3 + $0x18] sm:$0xff]   ;;  %vm988_vm6 = vcmask 130048   ;;  %s2353_s23 = smov 16   ;;  %s2354_s22 = smov 8  }
 0x1fe   : > { %1818 = vmatpush3.bf16.xpose.msra.mxu0 %v895_v42  ;;  %1819 = vmatprep.mubr.msk.bf16.mxu0 %vm2352_vm5, %v2351_v38  ;;  %v757_v44 = vld [vmem:[%s754_s20 + $0x20] sm:$0xff]  ;;  %v759_v45 = vmul.f32 0.35355338, %v755_v43  ;;  %v760_v51 = vmul.f32 0.35355338, %v756_v47  ;;  %v758_v54 = vld [vmem:[%s754_s20 + $0x30] sm:$0xff] }
 0x1ff   : > { %1811 = vmatprep.subr.bf16.mxu1 %v2351_v38  ;;  %v761_v46 = vmul.f32 0.35355338, %v757_v44  ;;  %1829 = vmatprep.subr.bf16.mxu0 %v2351_v38  ;;  %v946_v55 = vsel %vm788_vm4, %v2027_v52, 0  ;;  %v762_v56 = vmul.f32 0.35355338, %v758_v54  ;;  %v2029_v35 = vld [vmem:[#allocation4 + $0x8] sm:$0xff]  }
 0x200   : > { %v763_v48 = vpack.c.bf16 %v759_v45, %v759_v45  ;;  %v764_v53 = vpack.c.bf16 %v760_v51, %v760_v51  ;;  %v2030_v43 = vld [vmem:[#allocation4 + $0x10] sm:$0xff]   ;;  %s2355_s14 = smov 24   ;;  %vm1247_vm7 = vcmask 195584   ;;  %vm1273_vm8 = vcmask 261120  }
 0x201   : > { %v765_v49 = vpack.c.bf16 %v761_v46, %v761_v46  ;;  %v766_v57 = vpack.c.bf16 %v762_v56, %v762_v56  ;;  %vm1456_vm9 = vcmask 523264  }
 0x204   : > { %1808 = vmatmul.mubr.msk.bf16.vlgmr.msra.gmra.mxu1 %vm788_vm4, %v763_v48 }
 0x205   : > { %1820 = vmatmul.mubr.msk.bf16.vlgmr.msra.gmra.mxu0 %vm788_vm4, %v765_v49  ;;  %1812 = vmatpush3.bf16.xpose.msra.mxu1 %v844_v50  ;;  %v2031_v49 = vld [vmem:[#allocation4 + $0x18] sm:$0xff]  }
 0x206   : > { %1813 = vmatprep.mubr.msk.bf16.mxu1 %vm2352_vm5, %v2351_v38  ;;  %1823 = vmatprep.subr.bf16.mxu1 %v2351_v38 }
 0x207   : > { %1831 = vmatprep.mubr.msk.bf16.mxu0 %vm2352_vm5, %v2351_v38  ;;  %1830 = vmatpush3.bf16.msra.mxu0 %v2028_v34 }
 0x208   : > { %1841 = vmatprep.subr.bf16.mxu0 %v2351_v38 }
 0x20c   : > { %1814 = vmatmul.mubr.msk.bf16.vlgmr.msra.gmra.mxu1 %vm788_vm4, %v764_v53 }
 0x20d   : > { %1824 = vmatpush3.bf16.xpose.msra.mxu1 %v946_v55  ;;  %1825 = vmatprep.mubr.msk.bf16.mxu1 %vm2352_vm5, %v2351_v38  ;;  %v2032_v55 = vld [vmem:[#allocation5 + $0x8] sm:$0xff]  }
 0x20e   : > { %1835 = vmatprep.subr.bf16.mxu1 %v2351_v38 }
 0x214   : > { %1826 = vmatmul.mubr.msk.bf16.vlgmr.msra.gmra.mxu1 %vm788_vm4, %v766_v57 }
 0x215   : > { %1837 = vmatprep.mubr.msk.bf16.mxu1 %vm2352_vm5, %v2351_v38  ;;  %1836 = vmatpush3.bf16.msra.mxu1 %v2029_v35 }
 0x216   : > { %1847 = vmatprep.subr.bf16.mxu1 %v2351_v38 }
 0x2c4   : > { %v829_v58 = vpop.f32.mrf.mxu1 }
 0x2c5   : > { %v931_v59 = vpop.f32.mrf.mxu0  ;;  %v989_v60 = vsel %vm988_vm6, %v829_v58, -inf }
 0x2c6   : > { %v995_v61 = vsel %vm988_vm6, %v931_v59, -inf  ;;  %990 = vmax.xlane.f32.xlu0 %v989_v60  ;;  %v1809_v62 = vpop.f32.mrf.mxu1 }
 0x2c7   : > { %996 = vmax.xlane.f32.xlu1 %v995_v61  ;;  %v1821_v63 = vpop.f32.mrf.mxu0 }
 0x2c8   : > { %v832_v0 = vpop.f32.mrf.mxu1 }
 0x2c9   : > { %v934_v1 = vpop.f32.mrf.mxu0 }
 0x2ca   : > { %v1810_v2 = vpop.f32.mrf.mxu1 }
 0x2cb   : > { %v1822_v3 = vpop.f32.mrf.mxu0 }
 0x2cc   : > { %v880_v4 = vpop.f32.mrf.mxu1 }
 0x2cd   : > { %v992_v5 = vsel %vm988_vm6, %v880_v4, -inf }
 0x2ce   : > { %993 = vmax.xlane.f32.xlu0 %v992_v5  ;;  %v1815_v6 = vpop.f32.mrf.mxu1 }
 0x2d0   : > { %v883_v7 = vpop.f32.mrf.mxu1 }
 0x2d2   : > { %v1816_v8 = vpop.f32.mrf.mxu1 }
 0x2d4   : > { %v982_v9 = vpop.f32.mrf.mxu1 }
 0x2d5   : > { %v998_v10 = vsel %vm988_vm6, %v982_v9, -inf }
 0x2d6   : > { %999 = vmax.xlane.f32.xlu1 %v998_v10  ;;  %v1827_v11 = vpop.f32.mrf.mxu1 }
 0x2d8   : > { %v985_v12 = vpop.f32.mrf.mxu1 }
 0x2da   : > { %v1828_v13 = vpop.f32.mrf.mxu1 }
 0x34f   : > { %v991_v14 = vpop.xlane.xlu0 %990 }
 0x350   : > { %v997_v15 = vpop.xlane.xlu1 %996  ;;  %v1001_v16 = vsub.f32 %v829_v58, %v991_v14  ;;  %v2033_v58 = vld [vmem:[#allocation5] sm:$0xff]  }
 0x351   : > { %v1003_v17 = vsub.f32 %v931_v59, %v997_v15 }
 0x352   : > { %v1005_v18 = vmul.f32 1.442695, %v1001_v16  ;;  %v1744_v16 = vld [vmem:[%s2740_s4] ss:$0 sm:$0xff] }
 0x353   : > { %v1009_v19 = vmul.f32 1.442695, %v1003_v17 }
 0x354   : > { %2040 = vpow2.f32 %v1005_v18  ;;  %v753_v18 = vld [vmem:[%s752_s29] sm:$0xff] }
 0x355   : > { %2042 = vpow2.f32 %v1009_v19 }
 0x357   : > { %v994_v20 = vpop.xlane.xlu0 %993 }
 0x358   : > { %v1002_v21 = vsub.f32 %v880_v4, %v994_v20 }
 0x35a   : > { %v1007_v22 = vmul.f32 1.442695, %v1002_v21 }
 0x35c   : > { %2044 = vpow2.f32 %v1007_v22 }
 0x35f   : > { %v1000_v23 = vpop.xlane.xlu1 %999 }
 0x360   : > { %v1004_v24 = vsub.f32 %v982_v9, %v1000_v23 }
 0x361   : > { %v2041_v25 = vpop.eup %2040 }
 0x362   : > { %v1011_v26 = vmul.f32 1.442695, %v1004_v24  ;;  %v1013_v27 = vsel %vm988_vm6, %v2041_v25, 0.0  ;;  %v2043_v28 = vpop.eup %2042 }
 0x363   : > { %1014 = vadd.xlane.f32.xlu0 %v1013_v27  ;;  %v1019_v29 = vsel %vm988_vm6, %v2043_v28, 0.0 }
 0x364   : > { %2046 = vpow2.f32 %v1011_v26 }
 0x367   : > { %1020 = vadd.xlane.f32.xlu0 %v1019_v29 }
 0x369   : > { %v2045_v30 = vpop.eup %2044 }
 0x36a   : > { %v1016_v31 = vsel %vm988_vm6, %v2045_v30, 0.0 }
 0x36b   : > { %1017 = vadd.xlane.f32.xlu1 %v1016_v31  ;;  %v2035_v31 = vld [vmem:[#allocation10] sm:$0xff]  }
 0x371   : > { %v2047_v32 = vpop.eup %2046 }
 0x372   : > { %v1022_v33 = vsel %vm988_vm6, %v2047_v32, 0.0 }
 0x373   : > { %1023 = vadd.xlane.f32.xlu1 %v1022_v33  ;;  %v2037_v33 = vld [vmem:[%s2745_s9 + $0x10] sm:$0xff]  }
 0x3ec   : > { %v1015_v36 = vpop.xlane.xlu0 %1014 }
 0x3ed   : > { %2048 = vrcp.f32 %v1015_v36 }
 0x3f0   : > { %v1021_v37 = vpop.xlane.xlu0 %1020 }
 0x3f1   : > { %2050 = vrcp.f32 %v1021_v37 }
 0x3f4   : > { %v1018_v39 = vpop.xlane.xlu1 %1017 }
 0x3f5   : > { %2052 = vrcp.f32 %v1018_v39  ;;  %v1748_v39 = vld [vmem:[#allocation7] ss:$0 sm:$0xff] }
 0x3fa   : > { %v2049_v40 = vpop.eup %2048 }
 0x3fb   : > { %v1029_v41 = vmul.f32 %v2049_v40, %v2041_v25 }
 0x3fc   : > { %v1024_v42 = vpop.xlane.xlu1 %1023 }
 0x3fd   : > { %2054 = vrcp.f32 %v1024_v42  ;;  %v1033_v44 = vpack.c.bf16 %v1029_v41, %v1029_v41  ;;  %v1749_v41 = vld [vmem:[#allocation9] ss:$0 sm:$0xff] }
 0x3fe   : > { %v2051_v45 = vpop.eup %2050 }
 0x3ff   : > { %1832 = vmatmul.mubr.msk.bf16.vlgmr.msra.gmra.mxu0 %vm988_vm6, %v1033_v44  ;;  %v1031_v46 = vmul.f32 %v2051_v45, %v2043_v28  ;;  %v2038_v45 = vld [vmem:[%s2745_s9 + $0x8] sm:$0xff]  }
 0x400   : > { %1842 = vmatpush3.bf16.msra.mxu0 %v2030_v43  ;;  %1843 = vmatprep.mubr.msk.bf16.mxu0 %vm2352_vm5, %v2351_v38 }
 0x401   : > { %1853 = vmatprep.subr.bf16.mxu0 %v2351_v38  ;;  %v1035_v51 = vpack.c.bf16 %v1031_v46, %v1031_v46  ;;  %v2039_v46 = vld [vmem:[%s2745_s9] sm:$0xff]  }
 0x402   : > { %v2053_v47 = vpop.eup %2052 }
 0x403   : > { %v1030_v48 = vmul.f32 %v2053_v47, %v2045_v30  ;;  %v2034_v30 = vld [vmem:[#allocation10 + $0x8] sm:$0xff]   ;;  %v1750_v47 = vld [vmem:[#allocation12] ss:$0 sm:$0xff] }
 0x405   : > { %v1034_v50 = vpack.c.bf16 %v1030_v48, %v1030_v48 }
 0x407   : > { %1838 = vmatmul.mubr.msk.bf16.vlgmr.msra.gmra.mxu1 %vm988_vm6, %v1034_v50  ;;  %1844 = vmatmul.mubr.msk.bf16.vlgmr.msra.gmra.mxu0 %vm988_vm6, %v1035_v51 }
 0x408   : > { %1848 = vmatpush3.bf16.msra.mxu1 %v2031_v49  ;;  %1849 = vmatprep.mubr.msk.bf16.mxu1 %vm2352_vm5, %v2351_v38 }
 0x409   : > { %1857 = vmatprep.mubr.msk.bf16.mxu0 %vm2352_vm5, %v2351_v38  ;;  %1861 = vmatprep.subr.bf16.mxu1 %v2351_v38 }
 0x40a   : > { %v2055_v52 = vpop.eup %2054  ;;  %1854 = vmatpush3.bf16.msra.mxu0 %v2032_v55  ;;  %v1754_v55 = vld [vmem:[#allocation13] ss:$0 sm:$0xff] }
 0x40b   : > { %v1032_v53 = vmul.f32 %v2055_v52, %v2047_v32  ;;  %1855 = vmatprep.subr.bf16.mxu0 %v2351_v38  ;;  %v2036_v32 = vld [vmem:[%s2745_s9 + $0x18] sm:$0xff]  }
 0x40d   : > { %v1036_v54 = vpack.c.bf16 %v1032_v53, %v1032_v53 }
 0x40e   : > { %1856 = vmatpush3.bf16.msra.mxu0 %v2033_v58 }
 0x40f   : > { %1850 = vmatmul.mubr.msk.bf16.vlgmr.msra.gmra.mxu1 %vm988_vm6, %v1036_v54  ;;  %1869 = vmatprep.subr.bf16.mxu0 %v2351_v38 }
 0x410   : > { %1865 = vmatprep.mubr.msk.bf16.mxu1 %vm2352_vm5, %v2351_v38  ;;  %1862 = vmatpush3.bf16.msra.mxu1 %v2034_v30 }
 0x411   : > { %1863 = vmatprep.subr.bf16.mxu1 %v2351_v38 }
 0x414   : > { %1864 = vmatpush3.bf16.msra.mxu1 %v2035_v31 }
 0x4bf   : > { %v1080_v56 = vpop.f32.mrf.mxu0 }
 0x4c1   : > { %v1833_v57 = vpop.f32.mrf.mxu0 }
 0x4c3   : > { %v1083_v59 = vpop.f32.mrf.mxu0 }
 0x4c5   : > { %v1834_v60 = vpop.f32.mrf.mxu0 }
 0x4c7   : > { %v1129_v61 = vpop.f32.mrf.mxu1  ;;  %v1178_v62 = vpop.f32.mrf.mxu0 }
 0x4c8   : > { %1238 = vrot.lane.b32.xlu1 %v1178_v62, %s2353_s23  ;;  %1234 = vrot.lane.b32.xlu0 %v1129_v61, %s2354_s22 }
 0x4c9   : > { %v1839_v63 = vpop.f32.mrf.mxu1  ;;  %v1845_v0 = vpop.f32.mrf.mxu0 }
 0x4cb   : > { %v1132_v1 = vpop.f32.mrf.mxu1  ;;  %v1181_v2 = vpop.f32.mrf.mxu0 }
 0x4cd   : > { %v1840_v3 = vpop.f32.mrf.mxu1  ;;  %v1846_v4 = vpop.f32.mrf.mxu0 }
 0x4cf   : > { %v1227_v5 = vpop.f32.mrf.mxu1 }
 0x4d0   : > { %1242 = vrot.lane.b32.xlu1 %v1227_v5, %s2355_s14 }
 0x4d1   : > { %v1851_v6 = vpop.f32.mrf.mxu1 }
 0x4d3   : > { %v1230_v7 = vpop.f32.mrf.mxu1 }
 0x4d4   : > { %v1760_v7 = vld [vmem:[#allocation15] ss:$0 sm:$0xff] }
 0x4d5   : > { %v1852_v8 = vpop.f32.mrf.mxu1 }
 0x53a   : > { %v1235_v9 = vpop.permute.xlu0 %1234  ;;  %v1239_v10 = vpop.permute.xlu1 %1238 }
 0x53b   : > { %v1245_v11 = vsel %vm788_vm4, %v1080_v56, %v1235_v9  ;;  %v1761_v9 = vld [vmem:[#allocation16] ss:$0 sm:$0xff] }
 0x53c   : > { %v1246_v12 = vsel %vm988_vm6, %v1245_v11, %v1239_v10 }
 0x542   : > { %v1243_v13 = vpop.permute.xlu1 %1242 }
 0x543   : > { %v1248_v14 = vsel %vm1247_vm7, %v1246_v12, %v1243_v13 }
 0x544   : > { %v1249_v15 = vpack.c.bf16 %v1248_v14, %v1248_v14 }
 0x546   : > { %1858 = vmatmul.mubr.msk.bf16.vlgmr.msra.gmra.mxu0 %vm1273_vm8, %v1249_v15 }
 0x547   : > { %1877 = vmatprep.mubr.msk.bf16.mxu0 %vm2352_vm5, %v2351_v38  ;;  %1870 = vmatpush3.bf16.msra.mxu0 %v2036_v32 }
 0x548   : > { %1871 = vmatprep.subr.bf16.mxu0 %v2351_v38 }
 0x54b   : > { %1872 = vmatpush3.bf16.msra.mxu0 %v2037_v33 }
 0x54c   : > { %1873 = vmatprep.subr.bf16.mxu0 %v2351_v38 }
 0x54f   : > { %1874 = vmatpush3.bf16.msra.mxu0 %v2038_v45 }
 0x550   : > { %1875 = vmatprep.subr.bf16.mxu0 %v2351_v38 }
 0x553   : > { %1876 = vmatpush3.bf16.msra.mxu0 %v2039_v46 }
 0x606   : > { %v1311_v17 = vpop.f32.mrf.mxu0 }
 0x607   : > { %v1312_v19 = vadd.f32 %v1744_v16, %v1311_v17 }
 0x608   : > { %v1859_v20 = vpop.f32.mrf.mxu0 }
 0x609   : > { %v1317_v21 = vadd.f32 %v1312_v19, %v753_v18 }
 0x60a   : > { %v1314_v22 = vpop.f32.mrf.mxu0 }
 0x60b   : > { %v1320_v23 = vsel %vm1273_vm8, %v1317_v21, 0.0 }
 0x60c   : > { %v1860_v24 = vpop.f32.mrf.mxu0  ;;  %1321 = vadd.xlane.f32.xlu1 %v1320_v23 }
 0x695   : > { %v1322_v25 = vpop.xlane.xlu1 %1321 }
 0x696   : > { %v1324_v26 = vmul.f32 0.03125, %v1322_v25 }
 0x698   : > { %v1325_v27 = vsub.f32 %v1317_v21, %v1324_v26 }
 0x69a   : > { %v1326_v28 = vmul.f32 %v1325_v27, %v1325_v27 }
 0x69c   : > { %v1327_v29 = vsel %vm1273_vm8, %v1326_v28, 0.0 }
 0x69d   : > { %1328 = vadd.xlane.f32.xlu0 %v1327_v29 }
 0x726   : > { %v1329_v34 = vpop.xlane.xlu0 %1328 }
 0x727   : > { %v1330_v35 = vmul.f32 0.03125, %v1329_v34 }
 0x729   : > { %v1331_v36 = vadd.f32 1e-05, %v1330_v35 }
 0x72b   : > { %2056 = vrsqrt.f32 %v1331_v36 }
 0x738   : > { %v2057_v37 = vpop.eup %2056 }
 0x739   : > { %v1333_v40 = vmul.f32 %v2057_v37, %v1325_v27 }
 0x73b   : > { %v1340_v42 = vmul.f32 %v1748_v39, %v1333_v40 }
 0x73d   : > { %v1347_v43 = vadd.f32 %v1749_v41, %v1340_v42 }
 0x73f   : > { %v1348_v44 = vpack.c.bf16 %v1347_v43, %v1347_v43 }
 0x741   : > { %1866 = vmatmul.mubr.msk.bf16.vlgmr.msra.gmra.mxu1 %vm1273_vm8, %v1348_v44 }
 0x801   : > { %v1409_v48 = vpop.f32.mrf.mxu1 }
 0x802   : > { %v1410_v49 = vadd.f32 %v1750_v47, %v1409_v48 }
 0x803   : > { %v1867_v50 = vpop.f32.mrf.mxu1 }
 0x804   : > { %v1415_v51 = vmax.f32 %v1410_v49, 0.0 }
 0x805   : > { %v1412_v52 = vpop.f32.mrf.mxu1 }
 0x806   : > { %v1416_v53 = vpack.c.bf16 %v1415_v51, %v1415_v51 }
 0x807   : > { %v1868_v54 = vpop.f32.mrf.mxu1 }
 0x808   : > { %1878 = vmatmul.mubr.msk.bf16.vlgmr.msra.gmra.mxu0 %vm1456_vm9, %v1416_v53 }
 0x8c8   : > { %v1494_v56 = vpop.f32.mrf.mxu0 }
 0x8c9   : > { %v1495_v57 = vadd.f32 %v1754_v55, %v1494_v56 }
 0x8ca   : > { %v1879_v58 = vpop.f32.mrf.mxu0 }
 0x8cb   : > { %v1500_v38 = vadd.f32 %v1495_v57, %v1347_v43 }
 0x8cc   : > { %v1497_v59 = vpop.f32.mrf.mxu0 }
 0x8cd   : > { %v1503_v60 = vsel %vm1273_vm8, %v1500_v38, 0.0 }
 0x8ce   : > { %1504 = vadd.xlane.f32.xlu0 %v1503_v60  ;;  %v1880_v61 = vpop.f32.mrf.mxu0 }
 0x957   : > { %v1505_v62 = vpop.xlane.xlu0 %1504 }
 0x958   : > { %v1506_v63 = vmul.f32 0.03125, %v1505_v62 }
 0x95a   : > { %v1507_v0 = vsub.f32 %v1500_v38, %v1506_v63 }
 0x95c   : > { %v1508_v1 = vmul.f32 %v1507_v0, %v1507_v0 }
 0x95e   : > { %v1509_v2 = vsel %vm1273_vm8, %v1508_v1, 0.0 }
 0x95f   : > { %1510 = vadd.xlane.f32.xlu0 %v1509_v2 }
 0x9e8   : > { %v1511_v3 = vpop.xlane.xlu0 %1510 }
 0x9e9   : > { %v1512_v4 = vmul.f32 0.03125, %v1511_v3 }
 0x9eb   : > { %v1513_v5 = vadd.f32 1e-05, %v1512_v4 }
 0x9ed   : > { %2058 = vrsqrt.f32 %v1513_v5 }
 0x9fa   : > { %v2059_v6 = vpop.eup %2058 }
 0x9fb   : > { %v1515_v8 = vmul.f32 %v2059_v6, %v1507_v0 }
 0x9fd   : > { %v1522_v10 = vmul.f32 %v1760_v7, %v1515_v8 }
 0x9ff   : > { %v1529_v11 = vadd.f32 %v1761_v9, %v1522_v10 }
 0xa01   : > { %1530 = vst.msk [vmem:[%s2594_s18] sm:$0xff] %vm1273_vm8, %v1529_v11 }
 0xa02 PF: > { %s2771_s20 = sld [smem:[#allocation23_spill]]  ;;  %s2772_s25 = smov %s2318_s27 }
 0xa03   : > { %s2773_s26 = smov %s2322_s28  ;;  %s2774_s27 = smov %s2777_s19 }
 0xa04   : > { %s2775_s28 = smov %s2781_s30 }
 0xa08   : > { %s28_s29 = sadd.s32 1, %s2771_s20  }
 0xa09   : > { %p25_p9 = scmp.ge.s32.totalorder %s28_s29, 6  }
 0xa0b   :  { %27 = sbr.rel (!%p25_p9) target bundleno = 11 (0xb), region = 150 }
 0xa10   :  { %1558 = vsyncpa [#allocation6], 1 }
 0xa11   :  { %1560 = vsyncpa [#allocation6 + $0x1], 1 }
 0xa12   :  { %1561 = vsyncpa [#allocation8], 1 }
 0xa13   :  { %1562 = vsyncpa [#allocation11], 1 }
 0xa14   :  { %1563 = vsyncpa [#allocation14], 1 }
 0xa15   :  { %1564 = vsyncpa [#allocation17], 1 }

// kernel: transformer_encoder.3
= control target key start
LH: loop header
LB: loop body
LE: loop exit
PB: predicated region body
PF: predicated region fallthrough
CT: control target
= control target key end

     0   :  { %s2281_s0 = inlined_call_operand.vmem [shape: f32[2,16,32], index: 0, kind: input, shape index: {}]   ;;  %s2282_s1 = inlined_call_operand.vmem [shape: bf16[32,96], index: 1, kind: input, shape index: {}]   ;;  %s2283_s2 = inlined_call_operand.vmem [shape: f32[1,96], index: 2, kind: input, shape index: {}]   ;;  %s2284_s3 = inlined_call_operand.vmem [shape: bf16[32,32], index: 3, kind: input, shape index: {}]   ;;  %s2285_s4 = inlined_call_operand.vmem [shape: f32[1,32], index: 4, kind: input, shape index: {}]   ;;  %s2286_s5 = inlined_call_operand.vmem [shape: f32[1,32], index: 5, kind: input, shape index: {}]   ;;  %s2287_s6 = inlined_call_operand.vmem [shape: f32[1,32], index: 6, kind: input, shape index: {}]   ;;  %s2288_s7 = inlined_call_operand.vmem [shape: bf16[32,64], index: 7, kind: input, shape index: {}]   ;;  %s2289_s8 = inlined_call_operand.vmem [shape: f32[1,64], index: 8, kind: input, shape index: {}]   ;;  %s2290_s9 = inlined_call_operand.vmem [shape: bf16[64,32], index: 9, kind: input, shape index: {}]   ;;  %s2291_s10 = inlined_call_operand.vmem [shape: f32[1,32], index: 10, kind: input, shape index: {}]   ;;  %s2292_s11 = inlined_call_operand.vmem [shape: f32[1,32], index: 11, kind: input, shape index: {}]   ;;  %s2293_s12 = inlined_call_operand.vmem [shape: f32[1,32], index: 12, kind: input, shape index: {}]   ;;  %s2294_s13 = inlined_call_operand.hbm [shape: f32[2,16,32], index: 13, kind: output, shape index: {}]  }
   0x1   :  { %2302 = sst [smem:[#allocation14_spill]] %s2281_s0 }
   0x2   :  { %2303 = sst [smem:[#allocation15_spill]] %s2282_s1 }
   0x3   :  { %18 = vsyncpa [#allocation6], 0 }
   0x4   :  { %20 = vsyncpa [#allocation6 + $0x1], 0  ;;  %s1992_s25 = smov 0   ;;  %s1994_s26 = smov 0  }
   0x5   :  { %s1996_s27 = smov 0   ;;  %s1998_s28 = smov 0  }
   0x6   :  { %s2000_s29 = smov 0   ;;  %s2002_s30 = smov 0  }
   0x7   :  { %s2004_s14 = smov 0   ;;  %s2006_s15 = smov 0  }
   0x8 LB: > { %2304 = sst [smem:[#allocation8_spill]] %s1873_s25  ;;  %s1510_s16 = sadd.s32 4294967295, %s1901_s15   ;;  %s1901_s15 = sphi %s2006_s15, %s26_s15   ;;  %s1897_s14 = sphi %s2004_s14, %s2322_s14   ;;  %s1893_s30 = sphi %s2002_s30, %s2321_s30   ;;  %s1889_s29 = sphi %s2000_s29, %s2320_s29   ;;  %s1885_s28 = sphi %s1998_s28, %s2319_s28   ;;  %s1881_s27 = sphi %s1996_s27, %s2325_s27   ;;  %s1877_s26 = sphi %s1994_s26, %s2324_s26   ;;  %s1873_s25 = sphi %s1992_s25, %s2323_s25  }
   0x9   : > { %2305 = sst [smem:[#allocation9_spill]] %s1893_s30  ;;  %s1511_s17 = sadd.s32 4294967294, %s1901_s15  }
   0xa   : > { %2306 = sst [smem:[#allocation10_spill]] %s1897_s14  ;;  %s35_s18 = sadd.s32 1, %s1893_s30 }
   0xb   : > { %p36_p0 = scmp.ge.s32.totalorder %s35_s18, 2  ;;  %s38_s19 = sadd.s32 1, %s1897_s14 }
   0xc   : > { %p335_p1 = scmp.ne.s32.totalorder %s1881_s27, %s1877_s26  ;;  %p336_p2 = scmp.eq.s32.totalorder %s1510_s16, 3 }
   0xd   : > { %s2327_s18 = smov (%p36_p0, %s35_s18), 0  ;;  %s2329_s19 = smov (!%p36_p0, %s38_s19), %s1897_s14 }
   0xe   : > { %2307 = sst [smem:[#allocation11_spill]] %s2327_s18  ;;  %s321_s20 = ssub.s32 %s1893_s30, %s2327_s18 }
   0xf   : > { %p2043_p3 = por %p336_p2, %p335_p1  ;;  %p40_p4 = scmp.ge.s32.totalorder %s2329_s19, 2 }
  0x10   : > { %p341_p5 = scmp.ne.s32.totalorder %s1877_s26, %s1873_s25  ;;  %p342_p6 = scmp.eq.s32.totalorder %s1511_s17, 3 }
  0x11   : > { %p1514_p7 = scmp.ge.s32.totalorder %s1901_s15, 1  ;;  %s2331_s19 = smov (%p40_p4, %s2329_s19), 0 }
  0x12   : > { %2309 = sst [smem:[#allocation12_spill]] %s2331_s19  ;;  %p2052_p8 = por %p342_p6, %p341_p5 }
  0x13   : > { %p404_p9 = scmp.lt.s32.totalorder %s1901_s15, 5  ;;  %s320_s23 = ssub.s32 %s1897_s14, %s2331_s19 }
  0x14   : > { %s2310_s22 = scalar_select %p2052_p8, 1, 0 }
  0x15   : > { %s325_s24 = sadd.s32 1, %s1881_s27  ;;  %s322_s16 = sor.u32 %s321_s20, %s320_s23 }
  0x16   : > { %2311 = sst [smem:[#allocation13_spill]] %s2310_s22  ;;  %p405_p10 = pnand %p1514_p7, %p404_p9 }
  0x17   : > { %p323_p11 = scmp.eq.s32.totalorder %s322_s16, 0  ;;  %s2301_s17 = sand.u32 (!%p405_p10), 1, %s1877_s26  }
  0x18   : > { %408 = sbr.rel (%p405_p10) target bundleno = 2464 (0x9a0), region = 72  ;;  %p448_p12 = scmp.lt.s32.totalorder (!%p405_p10), %s1889_s29, 1 }
  0x19   : > { %s2061_s18 = scalar_select %p323_p11, %s1881_s27, %s325_s24  }
  0x1a   : > { %s2067_s30 = sshll.u32 (!%p405_p10), %s2301_s17, 3  ;;  %s2312_s0 = sld [smem:[#allocation14_spill]] (!%p405_p10) }
  0x1b   : > { %p1518_p13 = scmp.ne.s32.totalorder (!%p405_p10), %s1885_s28, 0 }
  0x1d   : > { %s449_s22 = scalar_select %p448_p12, %s1889_s29, 1 }
  0x1e   : > { %457 = sbr.rel (%p1518_p13) target bundleno = 397 (0x18d), region = 76  ;;  %s2313_s1 = sld [smem:[#allocation15_spill]] (!%p1518_p13) }
  0x1f   : > { %s1565_s25 = sshll.u32 %s449_s22, 4  ;;  %s1905_s19 = smov (!%p1518_p13), 120  }
  0x20   : > { %s2073_s20 = scalar_lea.vmem %s2312_s0, %s1565_s25  ;;  %s1906_s17 = smov (!%p1518_p13), 64  }
  0x21   : > { %s1907_s24 = smov (!%p1518_p13), 112   ;;  %s1908_s16 = smov (!%p1518_p13), 104  }
  0x22   : > { %s1909_s22 = smov (!%p1518_p13), 96   ;;  %s1910_s25 = smov (!%p1518_p13), 88  }
  0x23   : > { %v1903_v1 = vmov 0.0   ;;  %vm1904_vm0 = vmmov 0   ;;  %v458_v3 = vld [vmem:[%s2073_s20] sm:$0xff]  ;;  %v459_v4 = vld [vmem:[%s2073_s20 + $0x8] sm:$0xff]  ;;  %vm484_vm1 = vcmask 261120   ;;  %vm529_vm2 = vcmask 64512  }
  0x24   : > { %v1771_v0 = vld [vmem:[%s2313_s1 + $0x8] sm:$0xff]   ;;  %1598 = vmatprep.subr.bf16.mxu0 %v1903_v1  ;;  %v1772_v2 = vld [vmem:[%s2313_s1] sm:$0xff]   ;;  %1602 = vmatprep.mubr.msk.bf16.mxu0 %vm1904_vm0, %v1903_v1  ;;  %v460_v5 = vpack.c.bf16 %v459_v4, %v458_v3  ;;  %s1911_s14 = smov 56   ;;  %s1912_s23 = smov 80   ;;  %vm544_vm3 = vcmask 60416  }
  0x25   : > { %1599 = vmatpush3.bf16.msra.mxu0 %v1771_v0  ;;  %v1519_v6 = vld [vmem:[%s2283_s2] ss:$0 sm:$0xff]  ;;  %s1913_s0 = smov 48  }
  0x26   : > { %1600 = vmatprep.subr.bf16.mxu0 %v1903_v1 }
  0x29   : > { %1601 = vmatpush3.bf16.msra.mxu0 %v1772_v2 }
  0x2c   : > { %1603 = vmatmul.mubr.msk.bf16.vlgmr.msra.gmra.mxu0 %vm484_vm1, %v460_v5 }
  0xec   : > { %v522_v7 = vpop.f32.mrf.mxu0 }
  0xed   : > { %v523_v8 = vadd.f32 %v1519_v6, %v522_v7 }
  0xee   : > { %v1604_v9 = vpop.f32.mrf.mxu0 }
  0xef   : > { %530 = vst.msk [vmem:[#allocation2] sm:$0xff] %vm529_vm2, %v523_v8  ;;  %v1566_v10 = vpack.c.bf16 %v523_v8, %v523_v8  ;;  %557 = vrot.lane.b32.xlu0 %v523_v8, %s1905_s19 }
  0xf0   : > { %v525_v11 = vpop.f32.mrf.mxu0 }
  0xf1   : > { %v526_v12 = vadd.f32 %v1519_v6, %v525_v11  ;;  %547 = vrot.lane.b32.xlu1 %v1566_v10, %s1906_s17 }
  0xf2   : > { %v1605_v13 = vpop.f32.mrf.mxu0 }
  0xf3   : > { %531 = vst.msk [vmem:[#allocation2 + $0x8] sm:$0xff] %vm529_vm2, %v526_v12  ;;  %584 = vrot.lane.b32.xlu0 %v523_v8, %s1907_s24  ;;  %v1567_v14 = vpack.c.bf16 %v526_v12, %v526_v12 }
  0xf5   : > { %559 = vrot.lane.b32.xlu1 %v526_v12, %s1905_s19  ;;  %s1914_s19 = smov 72  }
  0xf7   : > { %611 = vrot.lane.b32.xlu0 %v523_v8, %s1908_s16 }
  0xf9   : > { %586 = vrot.lane.b32.xlu1 %v526_v12, %s1907_s24  ;;  %s1915_s24 = smov 40  }
  0xfb   : > { %538 = vrot.lane.b32.xlu0 %v1566_v10, %s1909_s22 }
  0xfd   : > { %613 = vrot.lane.b32.xlu1 %v526_v12, %s1908_s16 }
  0xff   : > { %566 = vrot.lane.b32.xlu0 %v1566_v10, %s1910_s25 }
 0x101   : > { %549 = vrot.lane.b32.xlu1 %v1567_v14, %s1906_s17 }
 0x103   : > { %575 = vrot.lane.b32.xlu0 %v1566_v10, %s1911_s14 }
 0x105   : > { %568 = vrot.lane.b32.xlu1 %v1567_v14, %s1910_s25 }
 0x107   : > { %593 = vrot.lane.b32.xlu0 %v1566_v10, %s1912_s23 }
 0x109   : > { %577 = vrot.lane.b32.xlu1 %v1567_v14, %s1911_s14 }
 0x10b   : > { %602 = vrot.lane.b32.xlu0 %v1566_v10, %s1913_s0 }
 0x10d   : > { %595 = vrot.lane.b32.xlu1 %v1567_v14, %s1912_s23 }
 0x10f   : > { %620 = vrot.lane.b32.xlu0 %v1566_v10, %s1914_s19 }
 0x111   : > { %604 = vrot.lane.b32.xlu1 %v1567_v14, %s1913_s0 }
 0x113   : > { %540 = vrot.lane.b32.xlu0 %v1567_v14, %s1909_s22 }
 0x115   : > { %622 = vrot.lane.b32.xlu1 %v1567_v14, %s1914_s19 }
 0x117   : > { %629 = vrot.lane.b32.xlu0 %v1566_v10, %s1915_s24 }
 0x119   : > { %631 = vrot.lane.b32.xlu1 %v1567_v14, %s1915_s24 }
 0x161   : > { %v558_v15 = vpop.permute.xlu0 %557 }
 0x162   : > { %564 = vst.msk [vmem:[#allocation2 + $0x10] sm:$0xff] %vm529_vm2, %v558_v15 }
 0x163   : > { %v548_v16 = vpop.permute.xlu1 %547 }
 0x164   : > { %553 = vst.msk [vmem:[#allocation4] sm:$0xf] %vm544_vm3, %v548_v16 }
 0x165   : > { %v585_v17 = vpop.permute.xlu0 %584 }
 0x166   : > { %591 = vst.msk [vmem:[#allocation2 + $0x20] sm:$0xff] %vm529_vm2, %v585_v17 }
 0x167   : > { %v560_v18 = vpop.permute.xlu1 %559 }
 0x168   : > { %565 = vst.msk [vmem:[#allocation2 + $0x18] sm:$0xff] %vm529_vm2, %v560_v18 }
 0x169   : > { %v612_v19 = vpop.permute.xlu0 %611 }
 0x16a   : > { %618 = vst.msk [vmem:[#allocation2 + $0x30] sm:$0xff] %vm529_vm2, %v612_v19 }
 0x16b   : > { %v587_v20 = vpop.permute.xlu1 %586 }
 0x16c   : > { %592 = vst.msk [vmem:[#allocation2 + $0x28] sm:$0xff] %vm529_vm2, %v587_v20 }
 0x16d   : > { %v539_v21 = vpop.permute.xlu0 %538 }
 0x16e   : > { %545 = vst.msk [vmem:[#allocation3] sm:$0xf] %vm544_vm3, %v539_v21 }
 0x16f   : > { %v614_v22 = vpop.permute.xlu1 %613 }
 0x170   : > { %619 = vst.msk [vmem:[#allocation2 + $0x38] sm:$0xff] %vm529_vm2, %v614_v22 }
 0x171   : > { %v567_v23 = vpop.permute.xlu0 %566 }
 0x172   : > { %573 = vst.msk [vmem:[#allocation3 + $0x8] sm:$0xf] %vm544_vm3, %v567_v23 }
 0x173   : > { %v550_v24 = vpop.permute.xlu1 %549 }
 0x174   : > { %554 = vst.msk [vmem:[#allocation4 + $0x4] sm:$0xf] %vm544_vm3, %v550_v24 }
 0x175   : > { %v576_v25 = vpop.permute.xlu0 %575 }
 0x176   : > { %582 = vst.msk [vmem:[#allocation4 + $0x8] sm:$0xf] %vm544_vm3, %v576_v25 }
 0x177   : > { %v569_v26 = vpop.permute.xlu1 %568 }
 0x178   : > { %574 = vst.msk [vmem:[#allocation3 + $0xc] sm:$0xf] %vm544_vm3, %v569_v26 }
 0x179   : > { %v594_v27 = vpop.permute.xlu0 %593 }
 0x17a   : > { %600 = vst.msk [vmem:[#allocation3 + $0x10] sm:$0xf] %vm544_vm3, %v594_v27 }
 0x17b   : > { %v578_v28 = vpop.permute.xlu1 %577 }
 0x17c   : > { %583 = vst.msk [vmem:[#allocation4 + $0xc] sm:$0xf] %vm544_vm3, %v578_v28 }
 0x17d   : > { %v603_v29 = vpop.permute.xlu0 %602 }
 0x17e   : > { %609 = vst.msk [vmem:[#allocation4 + $0x10] sm:$0xf] %vm544_vm3, %v603_v29 }
 0x17f   : > { %v596_v30 = vpop.permute.xlu1 %595 }
 0x180   : > { %601 = vst.msk [vmem:[#allocation3 + $0x14] sm:$0xf] %vm544_vm3, %v596_v30 }
 0x181   : > { %v621_v31 = vpop.permute.xlu0 %620 }
 0x182   : > { %627 = vst.msk [vmem:[#allocation3 + $0x18] sm:$0xf] %vm544_vm3, %v621_v31 }
 0x183   : > { %v605_v32 = vpop.permute.xlu1 %604 }
 0x184   : > { %610 = vst.msk [vmem:[#allocation4 + $0x14] sm:$0xf] %vm544_vm3, %v605_v32 }
 0x185   : > { %v541_v33 = vpop.permute.xlu0 %540 }
 0x186   : > { %546 = vst.msk [vmem:[#allocation3 + $0x4] sm:$0xf] %vm544_vm3, %v541_v33 }
 0x187   : > { %v623_v34 = vpop.permute.xlu1 %622 }
 0x188   : > { %628 = vst.msk [vmem:[#allocation3 + $0x1c] sm:$0xf] %vm544_vm3, %v623_v34 }
 0x189   : > { %v630_v35 = vpop.permute.xlu0 %629 }
 0x18a   : > { %636 = vst.msk [vmem:[#allocation4 + $0x18] sm:$0xf] %vm544_vm3, %v630_v35 }
 0x18b   : > { %v632_v36 = vpop.permute.xlu1 %631 }
 0x18c   : > { %637 = vst.msk [vmem:[#allocation4 + $0x1c] sm:$0xf] %vm544_vm3, %v632_v36 }
 0x18d PF: > { %v1773_v37 = vld [vmem:[#allocation3] sm:$0xff]   ;;  %v1916_v38 = vmov 0.0   ;;  %vm675_vm4 = vcmask 64512   ;;  %v1774_v39 = vld [vmem:[#allocation3 + $0x10] sm:$0xff]   ;;  %s1525_s0 = sshll.u32 %s1885_s28, 3  ;;  %v1775_v41 = vld [vmem:[#allocation3 + $0x8] sm:$0xff]  }
 0x18e   : > { %1606 = vmatprep.subr.bf16.mxu1 %v1916_v38  ;;  %1618 = vmatprep.subr.bf16.mxu0 %v1916_v38  ;;  %v680_v40 = vsel %vm675_vm4, %v1773_v37, 0  ;;  %v782_v42 = vsel %vm675_vm4, %v1774_v39, 0  ;;  %vm1917_vm5 = vmmov 0   ;;  %s641_s23 = scalar_lea.vmem [#allocation2], %s1525_s0  ;;  %v731_v50 = vsel %vm675_vm4, %v1775_v41, 0  ;;  %v1777_v34 = vld [vmem:[#allocation4] sm:$0xff]  }
 0x18f   : > { %1607 = vmatpush3.bf16.xpose.msra.mxu1 %v680_v40  ;;  %1608 = vmatprep.mubr.msk.bf16.mxu1 %vm1917_vm5, %v1916_v38  ;;  %v642_v43 = vld [vmem:[%s641_s23] sm:$0xff]  ;;  %v643_v47 = vld [vmem:[%s641_s23 + $0x10] sm:$0xff]  ;;  %v1776_v52 = vld [vmem:[#allocation3 + $0x18] sm:$0xff]   ;;  %vm875_vm6 = vcmask 130048   ;;  %s1918_s14 = smov 16   ;;  %s1919_s19 = smov 8  }
 0x190   : > { %1619 = vmatpush3.bf16.xpose.msra.mxu0 %v782_v42  ;;  %1620 = vmatprep.mubr.msk.bf16.mxu0 %vm1917_vm5, %v1916_v38  ;;  %v644_v44 = vld [vmem:[%s641_s23 + $0x20] sm:$0xff]  ;;  %v646_v45 = vmul.f32 0.35355338, %v642_v43  ;;  %v647_v51 = vmul.f32 0.35355338, %v643_v47  ;;  %v645_v54 = vld [vmem:[%s641_s23 + $0x30] sm:$0xff]  ;;  %s639_s23 = scalar_lea.vmem %s2073_s20, %s1525_s0 }
 0x191   : > { %1612 = vmatprep.subr.bf16.mxu1 %v1916_v38  ;;  %v648_v46 = vmul.f32 0.35355338, %v644_v44  ;;  %1630 = vmatprep.subr.bf16.mxu0 %v1916_v38  ;;  %v833_v55 = vsel %vm675_vm4, %v1776_v52, 0  ;;  %v649_v56 = vmul.f32 0.35355338, %v645_v54  ;;  %v1778_v35 = vld [vmem:[#allocation4 + $0x8] sm:$0xff]  }
 0x192   : > { %v650_v48 = vpack.c.bf16 %v646_v45, %v646_v45  ;;  %v651_v53 = vpack.c.bf16 %v647_v51, %v647_v51  ;;  %v1779_v43 = vld [vmem:[#allocation4 + $0x10] sm:$0xff]   ;;  %s1920_s24 = smov 24   ;;  %vm1134_vm7 = vcmask 195584   ;;  %vm1160_vm8 = vcmask 261120   ;;  %s1561_s20 = sshll.u32 %s1889_s29, 1 }
 0x193   : > { %v652_v49 = vpack.c.bf16 %v648_v46, %v648_v46  ;;  %v653_v57 = vpack.c.bf16 %v649_v56, %v649_v56  ;;  %vm1343_vm9 = vcmask 523264   ;;  %s1430_s0 = sadd.s32 %s1885_s28, %s1561_s20  ;;  %s2316_s20 = sand.u32 1, %s1877_s26  }
 0x194   : > { %s1419_s22 = scalar_lea.sflag [#allocation6], %s2316_s20 }
 0x196   : > { %1609 = vmatmul.mubr.msk.bf16.vlgmr.msra.gmra.mxu1 %vm675_vm4, %v650_v48 }
 0x197   : > { %1621 = vmatmul.mubr.msk.bf16.vlgmr.msra.gmra.mxu0 %vm675_vm4, %v652_v49  ;;  %1613 = vmatpush3.bf16.xpose.msra.mxu1 %v731_v50  ;;  %v1780_v49 = vld [vmem:[#allocation4 + $0x18] sm:$0xff]  }
 0x198   : > { %1614 = vmatprep.mubr.msk.bf16.mxu1 %vm1917_vm5, %v1916_v38  ;;  %1624 = vmatprep.subr.bf16.mxu1 %v1916_v38 }
 0x199   : > { %1632 = vmatprep.mubr.msk.bf16.mxu0 %vm1917_vm5, %v1916_v38  ;;  %1631 = vmatpush3.bf16.msra.mxu0 %v1777_v34 }
 0x19a   : > { %1642 = vmatprep.subr.bf16.mxu0 %v1916_v38 }
 0x19e   : > { %1615 = vmatmul.mubr.msk.bf16.vlgmr.msra.gmra.mxu1 %vm675_vm4, %v651_v53 }
 0x19f   : > { %1625 = vmatpush3.bf16.xpose.msra.mxu1 %v833_v55  ;;  %1626 = vmatprep.mubr.msk.bf16.mxu1 %vm1917_vm5, %v1916_v38  ;;  %v1781_v55 = vld [vmem:[%s2284_s3 + $0x8] sm:$0xff]  }
 0x1a0   : > { %1636 = vmatprep.subr.bf16.mxu1 %v1916_v38 }
 0x1a6   : > { %1627 = vmatmul.mubr.msk.bf16.vlgmr.msra.gmra.mxu1 %vm675_vm4, %v653_v57 }
 0x1a7   : > { %1638 = vmatprep.mubr.msk.bf16.mxu1 %vm1917_vm5, %v1916_v38  ;;  %1637 = vmatpush3.bf16.msra.mxu1 %v1778_v35 }
 0x1a8   : > { %1648 = vmatprep.subr.bf16.mxu1 %v1916_v38 }
 0x256   : > { %v716_v58 = vpop.f32.mrf.mxu1 }
 0x257   : > { %v818_v59 = vpop.f32.mrf.mxu0  ;;  %v876_v60 = vsel %vm875_vm6, %v716_v58, -inf }
 0x258   : > { %v882_v61 = vsel %vm875_vm6, %v818_v59, -inf  ;;  %877 = vmax.xlane.f32.xlu0 %v876_v60  ;;  %v1610_v62 = vpop.f32.mrf.mxu1 }
 0x259   : > { %883 = vmax.xlane.f32.xlu1 %v882_v61  ;;  %v1622_v63 = vpop.f32.mrf.mxu0 }
 0x25a   : > { %v719_v0 = vpop.f32.mrf.mxu1 }
 0x25b   : > { %v821_v1 = vpop.f32.mrf.mxu0 }
 0x25c   : > { %v1611_v2 = vpop.f32.mrf.mxu1 }
 0x25d   : > { %v1623_v3 = vpop.f32.mrf.mxu0 }
 0x25e   : > { %v767_v4 = vpop.f32.mrf.mxu1 }
 0x25f   : > { %v879_v5 = vsel %vm875_vm6, %v767_v4, -inf }
 0x260   : > { %880 = vmax.xlane.f32.xlu0 %v879_v5  ;;  %v1616_v6 = vpop.f32.mrf.mxu1 }
 0x262   : > { %v770_v7 = vpop.f32.mrf.mxu1 }
 0x264   : > { %v1617_v8 = vpop.f32.mrf.mxu1 }
 0x266   : > { %v869_v9 = vpop.f32.mrf.mxu1 }
 0x267   : > { %v885_v10 = vsel %vm875_vm6, %v869_v9, -inf }
 0x268   : > { %886 = vmax.xlane.f32.xlu1 %v885_v10  ;;  %v1628_v11 = vpop.f32.mrf.mxu1 }
 0x26a   : > { %v872_v12 = vpop.f32.mrf.mxu1 }
 0x26c   : > { %v1629_v13 = vpop.f32.mrf.mxu1 }
 0x2e1   : > { %v878_v14 = vpop.xlane.xlu0 %877 }
 0x2e2   : > { %v884_v15 = vpop.xlane.xlu1 %883  ;;  %v888_v16 = vsub.f32 %v716_v58, %v878_v14  ;;  %v1782_v58 = vld [vmem:[%s2284_s3] sm:$0xff]  }
 0x2e3   : > { %v890_v17 = vsub.f32 %v818_v59, %v884_v15 }
 0x2e4   : > { %v892_v18 = vmul.f32 1.442695, %v888_v16  ;;  %v1542_v16 = vld [vmem:[%s2285_s4] ss:$0 sm:$0xff] }
 0x2e5   : > { %v896_v19 = vmul.f32 1.442695, %v890_v17 }
 0x2e6   : > { %1789 = vpow2.f32 %v892_v18  ;;  %v640_v18 = vld [vmem:[%s639_s23] sm:$0xff]  ;;  %s2314_s23 = scalar_lea.vmem [#allocation5], %s2067_s30 }
 0x2e7   : > { %1791 = vpow2.f32 %v896_v19  ;;  %s1434_s17 = sshll.u32 %s2314_s23, 4  ;;  %s2315_s28 = smov %s2314_s23  ;;  %s1435_s17 = int_to_ptr.vmem [resolvable:$true] %s1434_s17 }
 0x2e8   : > { %s1809_s25 = scalar_lea.vmem %s1435_s17, 128 }
 0x2e9   : > { %v881_v20 = vpop.xlane.xlu0 %880  ;;  %p1810_p0 = scmp.ne.s32.totalorder %s1435_s17, %s1809_s25 }
 0x2ea   : > { %v889_v21 = vsub.f32 %v767_v4, %v881_v20 }
 0x2eb   : > { %p1811_p1 = pnand %p1810_p0, %p2043_p3 }
 0x2ec   : > { %v894_v22 = vmul.f32 1.442695, %v889_v21 }
 0x2ed   : > { %p1812_p2 = pneg %p1811_p1 }
 0x2ee   : > { %1793 = vpow2.f32 %v894_v22 }
 0x2f1   : > { %v887_v23 = vpop.xlane.xlu1 %886 }
 0x2f2   : > { %v891_v24 = vsub.f32 %v869_v9, %v887_v23 }
 0x2f3   : > { %v1790_v25 = vpop.eup %1789 }
 0x2f4   : > { %v898_v26 = vmul.f32 1.442695, %v891_v24  ;;  %v900_v27 = vsel %vm875_vm6, %v1790_v25, 0.0  ;;  %v1792_v28 = vpop.eup %1791 }
 0x2f5   : > { %901 = vadd.xlane.f32.xlu0 %v900_v27  ;;  %v906_v29 = vsel %vm875_vm6, %v1792_v28, 0.0 }
 0x2f6   : > { %1795 = vpow2.f32 %v898_v26 }
 0x2f9   : > { %907 = vadd.xlane.f32.xlu0 %v906_v29 }
 0x2fb   : > { %v1794_v30 = vpop.eup %1793 }
 0x2fc   : > { %v903_v31 = vsel %vm875_vm6, %v1794_v30, 0.0 }
 0x2fd   : > { %904 = vadd.xlane.f32.xlu1 %v903_v31  ;;  %v1784_v31 = vld [vmem:[%s2288_s7] sm:$0xff]  }
 0x303   : > { %v1796_v32 = vpop.eup %1795 }
 0x304   : > { %v909_v33 = vsel %vm875_vm6, %v1796_v32, 0.0 }
 0x305   : > { %910 = vadd.xlane.f32.xlu1 %v909_v33  ;;  %v1786_v33 = vld [vmem:[%s2290_s9 + $0x10] sm:$0xff]  }
 0x37e   : > { %v902_v36 = vpop.xlane.xlu0 %901 }
 0x37f   : > { %1797 = vrcp.f32 %v902_v36 }
 0x382   : > { %v908_v37 = vpop.xlane.xlu0 %907 }
 0x383   : > { %1799 = vrcp.f32 %v908_v37 }
 0x386   : > { %v905_v39 = vpop.xlane.xlu1 %904 }
 0x387   : > { %1801 = vrcp.f32 %v905_v39  ;;  %v1546_v39 = vld [vmem:[%s2286_s5] ss:$0 sm:$0xff] }
 0x38c   : > { %v1798_v40 = vpop.eup %1797 }
 0x38d   : > { %v916_v41 = vmul.f32 %v1798_v40, %v1790_v25 }
 0x38e   : > { %v911_v42 = vpop.xlane.xlu1 %910 }
 0x38f   : > { %1803 = vrcp.f32 %v911_v42  ;;  %v920_v44 = vpack.c.bf16 %v916_v41, %v916_v41  ;;  %v1547_v41 = vld [vmem:[%s2287_s6] ss:$0 sm:$0xff] }
 0x390   : > { %v1800_v45 = vpop.eup %1799 }
 0x391   : > { %1633 = vmatmul.mubr.msk.bf16.vlgmr.msra.gmra.mxu0 %vm875_vm6, %v920_v44  ;;  %v918_v46 = vmul.f32 %v1800_v45, %v1792_v28  ;;  %v1787_v45 = vld [vmem:[%s2290_s9 + $0x8] sm:$0xff]  }
 0x392   : > { %1643 = vmatpush3.bf16.msra.mxu0 %v1779_v43  ;;  %1644 = vmatprep.mubr.msk.bf16.mxu0 %vm1917_vm5, %v1916_v38 }
 0x393   : > { %1654 = vmatprep.subr.bf16.mxu0 %v1916_v38  ;;  %v922_v51 = vpack.c.bf16 %v918_v46, %v918_v46  ;;  %v1788_v46 = vld [vmem:[%s2290_s9] sm:$0xff]  }
 0x394   : > { %v1802_v47 = vpop.eup %1801 }
 0x395   : > { %v917_v48 = vmul.f32 %v1802_v47, %v1794_v30  ;;  %v1783_v30 = vld [vmem:[%s2288_s7 + $0x8] sm:$0xff]   ;;  %v1548_v47 = vld [vmem:[%s2289_s8] ss:$0 sm:$0xff] }
 0x397   : > { %v921_v50 = vpack.c.bf16 %v917_v48, %v917_v48 }
 0x399   : > { %1639 = vmatmul.mubr.msk.bf16.vlgmr.msra.gmra.mxu1 %vm875_vm6, %v921_v50  ;;  %1645 = vmatmul.mubr.msk.bf16.vlgmr.msra.gmra.mxu0 %vm875_vm6, %v922_v51 }
 0x39a   : > { %1649 = vmatpush3.bf16.msra.mxu1 %v1780_v49  ;;  %1650 = vmatprep.mubr.msk.bf16.mxu1 %vm1917_vm5, %v1916_v38 }
 0x39b   : > { %1658 = vmatprep.mubr.msk.bf16.mxu0 %vm1917_vm5, %v1916_v38  ;;  %1662 = vmatprep.subr.bf16.mxu1 %v1916_v38 }
 0x39c   : > { %v1804_v52 = vpop.eup %1803  ;;  %1655 = vmatpush3.bf16.msra.mxu0 %v1781_v55 }
 0x39d   : > { %v919_v53 = vmul.f32 %v1804_v52, %v1796_v32  ;;  %1656 = vmatprep.subr.bf16.mxu0 %v1916_v38  ;;  %v1785_v32 = vld [vmem:[%s2290_s9 + $0x18] sm:$0xff]  }
 0x39f   : > { %v923_v54 = vpack.c.bf16 %v919_v53, %v919_v53 }
 0x3a0   : > { %1657 = vmatpush3.bf16.msra.mxu0 %v1782_v58 }
 0x3a1   : > { %1651 = vmatmul.mubr.msk.bf16.vlgmr.msra.gmra.mxu1 %vm875_vm6, %v923_v54  ;;  %1670 = vmatprep.subr.bf16.mxu0 %v1916_v38 }
 0x3a2   : > { %1666 = vmatprep.mubr.msk.bf16.mxu1 %vm1917_vm5, %v1916_v38  ;;  %1663 = vmatpush3.bf16.msra.mxu1 %v1783_v30 }
 0x3a3   : > { %1664 = vmatprep.subr.bf16.mxu1 %v1916_v38 }
 0x3a6   : > { %1665 = vmatpush3.bf16.msra.mxu1 %v1784_v31 }
 0x451   : > { %v967_v56 = vpop.f32.mrf.mxu0 }
 0x453   : > { %v1634_v57 = vpop.f32.mrf.mxu0 }
 0x455   : > { %v970_v59 = vpop.f32.mrf.mxu0 }
 0x457   : > { %v1635_v60 = vpop.f32.mrf.mxu0 }
 0x459   : > { %v1016_v61 = vpop.f32.mrf.mxu1  ;;  %v1065_v62 = vpop.f32.mrf.mxu0 }
 0x45a   : > { %1125 = vrot.lane.b32.xlu1 %v1065_v62, %s1918_s14  ;;  %1121 = vrot.lane.b32.xlu0 %v1016_v61, %s1919_s19 }
 0x45b   : > { %v1640_v63 = vpop.f32.mrf.mxu1  ;;  %v1646_v0 = vpop.f32.mrf.mxu0 }
 0x45d   : > { %v1019_v1 = vpop.f32.mrf.mxu1  ;;  %v1068_v2 = vpop.f32.mrf.mxu0 }
 0x45f   : > { %v1641_v3 = vpop.f32.mrf.mxu1  ;;  %v1647_v4 = vpop.f32.mrf.mxu0 }
 0x461   : > { %v1114_v5 = vpop.f32.mrf.mxu1 }
 0x462   : > { %1129 = vrot.lane.b32.xlu1 %v1114_v5, %s1920_s24  ;;  %s1562_s24 = sshll.u32 %s1430_s0, 7  ;;  %s1921_s0 = smov [#allocation5]  }
 0x463   : > { %v1652_v6 = vpop.f32.mrf.mxu1  ;;  %s1432_s29 = scalar_lea.hbm %s2294_s13, %s1562_s24  ;;  %s1813_s14 = sshll.u32 %s1921_s0, 4  ;;  %s1814_s14 = int_to_ptr.vmem [resolvable:$false] %s1813_s14 }
 0x464   : > { %s1815_s19 = scalar_lea.vmem %s1814_s14, 256  ;;  %p1816_p4 = scmp.lt.s32.totalorder %s1435_s17, %s1814_s14 }
 0x465   : > { %v1117_v7 = vpop.f32.mrf.mxu1  ;;  %p1817_p5 = scmp.lt.s32.totalorder %s1815_s19, %s1809_s25 }
 0x466   : > { %v1558_v7 = vld [vmem:[%s2292_s11] ss:$0 sm:$0xff] }
 0x467   : > { %v1653_v8 = vpop.f32.mrf.mxu1  ;;  %p1818_p6 = por %p1817_p5, %p1816_p4 }
 0x469   : > { %p1819_p7 = pnand %p1818_p6, %p1812_p2 }
 0x4cc   : > { %v1122_v9 = vpop.permute.xlu0 %1121  ;;  %v1126_v10 = vpop.permute.xlu1 %1125 }
 0x4cd   : > { %v1132_v11 = vsel %vm675_vm4, %v967_v56, %v1122_v9  ;;  %v1559_v9 = vld [vmem:[%s2293_s12] ss:$0 sm:$0xff] }
 0x4ce   : > { %v1133_v12 = vsel %vm875_vm6, %v1132_v11, %v1126_v10 }
 0x4d4   : > { %v1130_v13 = vpop.permute.xlu1 %1129 }
 0x4d5   : > { %v1135_v14 = vsel %vm1134_vm7, %v1133_v12, %v1130_v13 }
 0x4d6   : > { %v1136_v15 = vpack.c.bf16 %v1135_v14, %v1135_v14 }
 0x4d8   : > { %1659 = vmatmul.mubr.msk.bf16.vlgmr.msra.gmra.mxu0 %vm1160_vm8, %v1136_v15 }
 0x4d9   : > { %1678 = vmatprep.mubr.msk.bf16.mxu0 %vm1917_vm5, %v1916_v38  ;;  %1671 = vmatpush3.bf16.msra.mxu0 %v1785_v32 }
 0x4da   : > { %1672 = vmatprep.subr.bf16.mxu0 %v1916_v38 }
 0x4dd   : > { %1673 = vmatpush3.bf16.msra.mxu0 %v1786_v33 }
 0x4de   : > { %1674 = vmatprep.subr.bf16.mxu0 %v1916_v38 }
 0x4e1   : > { %1675 = vmatpush3.bf16.msra.mxu0 %v1787_v45 }
 0x4e2   : > { %1676 = vmatprep.subr.bf16.mxu0 %v1916_v38  ;;  %v1552_v38 = vld [vmem:[%s2291_s10] ss:$0 sm:$0xff] }
 0x4e5   : > { %1677 = vmatpush3.bf16.msra.mxu0 %v1788_v46 }
 0x598   : > { %v1198_v17 = vpop.f32.mrf.mxu0 }
 0x599   : > { %v1199_v19 = vadd.f32 %v1542_v16, %v1198_v17 }
 0x59a   : > { %v1660_v20 = vpop.f32.mrf.mxu0 }
 0x59b   : > { %v1204_v21 = vadd.f32 %v1199_v19, %v640_v18 }
 0x59c   : > { %v1201_v22 = vpop.f32.mrf.mxu0 }
 0x59d   : > { %v1207_v23 = vsel %vm1160_vm8, %v1204_v21, 0.0 }
 0x59e   : > { %v1661_v24 = vpop.f32.mrf.mxu0  ;;  %1208 = vadd.xlane.f32.xlu1 %v1207_v23 }
 0x627   : > { %v1209_v25 = vpop.xlane.xlu1 %1208 }
 0x628   : > { %v1211_v26 = vmul.f32 0.03125, %v1209_v25 }
 0x62a   : > { %v1212_v27 = vsub.f32 %v1204_v21, %v1211_v26 }
 0x62c   : > { %v1213_v28 = vmul.f32 %v1212_v27, %v1212_v27 }
 0x62e   : > { %v1214_v29 = vsel %vm1160_vm8, %v1213_v28, 0.0 }
 0x62f   : > { %1215 = vadd.xlane.f32.xlu0 %v1214_v29 }
 0x6b8   : > { %v1216_v34 = vpop.xlane.xlu0 %1215 }
 0x6b9   : > { %v1217_v35 = vmul.f32 0.03125, %v1216_v34 }
 0x6bb   : > { %v1218_v36 = vadd.f32 1e-05, %v1217_v35 }
 0x6bd   : > { %1805 = vrsqrt.f32 %v1218_v36 }
 0x6ca   : > { %v1806_v37 = vpop.eup %1805 }
 0x6cb   : > { %v1220_v40 = vmul.f32 %v1806_v37, %v1212_v27 }
 0x6cd   : > { %v1227_v42 = vmul.f32 %v1546_v39, %v1220_v40 }
 0x6cf   : > { %v1234_v43 = vadd.f32 %v1547_v41, %v1227_v42 }
 0x6d1   : > { %v1235_v44 = vpack.c.bf16 %v1234_v43, %v1234_v43 }
 0x6d3   : > { %1667 = vmatmul.mubr.msk.bf16.vlgmr.msra.gmra.mxu1 %vm1160_vm8, %v1235_v44 }
 0x793   : > { %v1296_v48 = vpop.f32.mrf.mxu1 }
 0x794   : > { %v1297_v49 = vadd.f32 %v1548_v47, %v1296_v48 }
 0x795   : > { %v1668_v50 = vpop.f32.mrf.mxu1 }
 0x796   : > { %v1302_v51 = vmax.f32 %v1297_v49, 0.0 }
 0x797   : > { %v1299_v52 = vpop.f32.mrf.mxu1 }
 0x798   : > { %v1303_v53 = vpack.c.bf16 %v1302_v51, %v1302_v51 }
 0x799   : > { %v1669_v54 = vpop.f32.mrf.mxu1 }
 0x79a   : > { %1679 = vmatmul.mubr.msk.bf16.vlgmr.msra.gmra.mxu0 %vm1343_vm9, %v1303_v53 }
 0x85a   : > { %v1381_v55 = vpop.f32.mrf.mxu0 }
 0x85b   : > { %v1382_v56 = vadd.f32 %v1552_v38, %v1381_v55 }
 0x85c   : > { %v1680_v57 = vpop.f32.mrf.mxu0 }
 0x85d   : > { %v1387_v58 = vadd.f32 %v1382_v56, %v1234_v43 }
 0x85e   : > { %v1384_v59 = vpop.f32.mrf.mxu0 }
 0x85f   : > { %v1390_v60 = vsel %vm1160_vm8, %v1387_v58, 0.0 }
 0x860   : > { %1391 = vadd.xlane.f32.xlu0 %v1390_v60  ;;  %v1681_v61 = vpop.f32.mrf.mxu0 }
 0x8e9   : > { %v1392_v62 = vpop.xlane.xlu0 %1391 }
 0x8ea   : > { %v1393_v63 = vmul.f32 0.03125, %v1392_v62 }
 0x8ec   : > { %v1394_v0 = vsub.f32 %v1387_v58, %v1393_v63 }
 0x8ee   : > { %v1395_v1 = vmul.f32 %v1394_v0, %v1394_v0 }
 0x8f0   : > { %v1396_v2 = vsel %vm1160_vm8, %v1395_v1, 0.0 }
 0x8f1   : > { %1397 = vadd.xlane.f32.xlu0 %v1396_v2 }
 0x97a   : > { %v1398_v3 = vpop.xlane.xlu0 %1397 }
 0x97b   : > { %v1399_v4 = vmul.f32 0.03125, %v1398_v3 }
 0x97d   : > { %v1400_v5 = vadd.f32 1e-05, %v1399_v4 }
 0x97f   : > { %1807 = vrsqrt.f32 %v1400_v5 }
 0x98c   : > { %v1808_v6 = vpop.eup %1807 }
 0x98d   : > { %v1402_v8 = vmul.f32 %v1808_v6, %v1394_v0 }
 0x98f   : > { %v1409_v10 = vmul.f32 %v1558_v7, %v1402_v8 }
 0x991   : > { %v1416_v11 = vadd.f32 %v1559_v9, %v1409_v10 }
 0x993   : > { %1417 = vst.msk [vmem:[%s2315_s28] sm:$0xff] %vm1160_vm8, %v1416_v11 }
 0x994   : > { %1822 = shalt.err (!%p1819_p7)
}
 0x995   : > { %s1823_s1 = scalar_lea.hbm %s1432_s29, 128  ;;  %s1827_s23 = scalar_lea.hbm %s2294_s13, 512 }
 0x996   : > { %p1824_p9 = scmp.ne.s32.totalorder %s1432_s29, %s1823_s1  ;;  %p1828_p12 = scmp.lt.s32.totalorder %s1432_s29, %s2294_s13 }
 0x997   : > { %p1829_p13 = scmp.lt.s32.totalorder %s1827_s23, %s1823_s1 }
 0x998   : > { %p1825_p10 = pnand %p1824_p9, %p2043_p3 }
 0x999   : > { %p1830_p0 = por %p1829_p13, %p1828_p12 }
 0x99a   : > { %p1826_p11 = pneg %p1825_p10 }
 0x99c   : > { %p1831_p1 = pnand %p1830_p0, %p1826_p11 }
 0x99e   : > { %1834 = shalt.err (!%p1831_p1)
}
 0x99f   : > { %1682 = dma.vmem_to_hbm [thread:$0]  (%p2043_p3), %s1435_s17, 128, %s1432_s29, %s1419_s22  }
 0x9a0 PF: > { %s2317_s20 = sld [smem:[#allocation8_spill]]  ;;  %p1688_p2 = scmp.ge.s32.totalorder %s1901_s15, 2 }
 0x9a2   : > { %p1685_p4 = pnand %p1688_p2, %p2052_p8 }
 0x9a4   : > { %p1686_p5 = pneg %p1685_p4 }
 0x9a6   : > { %s1446_s0 = sand.u32 1, %s2317_s20  }
 0x9a7   : > { %s1447_s14 = scalar_lea.sflag [#allocation6], %s1446_s0 }
 0x9a8   : > { %1868 = dma.done.wait (%p1686_p5), %s1447_s14, 128  }
 0x9a9   : > { %1870 = vsyncadd (%p1686_p5), %s1447_s14, 4294967168  ;;  %s26_s15 = sadd.s32 1, %s1901_s15   ;;  %s2319_s28 = sld [smem:[#allocation9_spill]] }
 0x9aa   : > { %p23_p6 = scmp.ge.s32.totalorder %s26_s15, 6   ;;  %s2320_s29 = sld [smem:[#allocation10_spill]] }
 0x9ab   : > { %s2321_s30 = sld [smem:[#allocation11_spill]]  ;;  %s2323_s25 = smov %s1877_s26 }
 0x9ac   : > { %s2322_s14 = sld [smem:[#allocation12_spill]]  ;;  %s2324_s26 = smov %s1881_s27 }
 0x9ad   : > { %s2325_s27 = smov %s2061_s18  ;;  %25 = sbr.rel (!%p23_p6) target bundleno = 8 (0x8), region = 122 }
 0x9b2   :  { %1452 = vsyncpa [#allocation6], 1 }
 0x9b3   :  { %1454 = vsyncpa [#allocation6 + $0x1], 1 }

</bundles_post_ra>
